<compile_context>
chip_gen: v7x
topology: tpu7x:2x2x1
jax: 0.10.0
libtpu: 0.0.40
codegen_flags: <defaults>
</compile_context>

<pallas_src>
import functools
import math

import jax
import jax.numpy as jnp
from jax.experimental import pallas as pl
from jax.experimental.pallas import tpu as pltpu


def _mha_kernel(x_ref, wqkv_ref, bqkv_ref, wo_ref, bo_ref, o_ref, ctx_ref, *,
                num_heads, d_kqv, compute_dtype, approx_recip):
    Bb, S, D = x_ref.shape
    Dh = num_heads * d_kqv
    M = Bb * S

    # ---- fused QKV projection: one (M, D) @ (D, 3*Dh) matmul ----------------
    # Weights arrive pre-transposed, pre-concatenated and already in the
    # compute dtype.  1/sqrt(dk) is folded into the Q columns host-side.
    x2 = x_ref[...].reshape(M, D).astype(compute_dtype)
    qkv = jnp.dot(x2, wqkv_ref[...],
                  preferred_element_type=jnp.float32)          # (M, 3*Dh) f32
    qkv = jnp.maximum(qkv + bqkv_ref[...], 0.0)                # bias + ReLU (dropout = id)

    # ---- attention: batched over block-batch rows, static loop on heads -----
    for h in range(num_heads):                                 # H small & static
        lo = h * d_kqv
        q_h = qkv[:, lo:lo + d_kqv].reshape(Bb, S, d_kqv).astype(compute_dtype)
        k_h = qkv[:, Dh + lo:Dh + lo + d_kqv].reshape(Bb, S, d_kqv).astype(compute_dtype)
        v_h = qkv[:, 2 * Dh + lo:2 * Dh + lo + d_kqv].reshape(Bb, S, d_kqv).astype(compute_dtype)

        # scores for all Bb rows at once (single leading batch dim)
        s = jnp.einsum("bqd,bkd->bqk", q_h, k_h,
                       preferred_element_type=jnp.float32)     # (Bb, S, S) f32

        # softmax numerator in f32; normalization deferred to after the PV
        # matmul (scales (Bb,S,d_kqv) instead of (Bb,S,S)).
        m = jnp.max(s, axis=-1, keepdims=True)
        e = jnp.exp(s - m)
        l = jnp.sum(e, axis=-1, keepdims=True)                 # (Bb, S, 1)

        ctx = jnp.einsum("bqk,bkd->bqd", e.astype(compute_dtype), v_h,
                         preferred_element_type=jnp.float32)   # (Bb, S, dk) f32
        if approx_recip:
            inv_l = pl.reciprocal(l, approx=True)              # EUP slot
        else:
            inv_l = 1.0 / l                                    # exact (f32 check path)
        ctx = ctx * inv_l

        # place this head's context at its lane offset in the (M, Dh) scratch
        ctx_ref[:, lo:lo + d_kqv] = ctx.reshape(M, d_kqv).astype(ctx_ref.dtype)

    # ---- single fat output projection: (M, Dh) @ (Dh, D) --------------------
    out = jnp.dot(ctx_ref[...], wo_ref[...],
                  preferred_element_type=jnp.float32)
    out = jnp.maximum(out + bo_ref[...], 0.0)                  # output Linear + ReLU
    o_ref[...] = out.reshape(Bb, S, D).astype(o_ref.dtype)


def _vmem_capacity_bytes():
    try:
        info = pltpu.get_tpu_info()
        cap = getattr(info, "vmem_capacity_bytes", None)
        if cap:
            return int(cap)
    except Exception:
        pass
    return 64 * 1024 * 1024   # conservative fallback: v7x per-TensorCore VMEM


def multi_head_attention(x, params, *, num_heads, d_kqv, block_b=None,
                         compute_dtype=jnp.bfloat16):
    """x: (B, S, D) float32.  params: PyTorch-Linear-layout weights/biases."""
    B, S, D = x.shape
    Dh = num_heads * d_kqv
    f32b = 4
    cbytes = jnp.dtype(compute_dtype).itemsize

    # ---- generation-aware VMEM budget -> block_b -----------------------------
    cap = _vmem_capacity_bytes()
    budget = int(0.80 * cap)
    weight_bytes = (D * 3 * Dh + Dh * D) * cbytes + (3 * Dh + D) * f32b
    per_row = (
        2 * 2 * S * D * f32b                 # double-buffered x in + out blocks
        + S * D * cbytes                     # compute-dtype copy of x block
        + S * 3 * Dh * f32b                  # fused QKV activations (f32)
        + 3 * S * d_kqv * cbytes             # one head's q/k/v slices
        + S * S * (f32b + cbytes)            # scores e (f32) + compute-dtype copy
        + S * Dh * cbytes                    # ctx scratch
        + S * D * f32b                       # output-projection f32 result
    )
    block_b_budget = max(1, (budget - weight_bytes - (4 << 20)) // per_row)

    if block_b is None:
        block_b = max(1, min(B, block_b_budget))
        if B >= 2:
            # keep >= 2 grid steps so the "parallel" axis feeds both v7x cores
            block_b = min(block_b, -(-B // 2))

    Bp = pl.cdiv(B, block_b) * block_b
    x_in = x if Bp == B else jnp.pad(x, ((0, Bp - B), (0, 0), (0, 0)))

    # ---- host-side layout plumbing (done once, outside the kernel) ----------
    # transpose to (in, out), fuse QKV, fold 1/sqrt(dk) into Wq/bq (ReLU is
    # positively homogeneous so this is exact), cast weights to compute dtype.
    scale = d_kqv ** (-0.5)
    wqkv_t = jnp.concatenate(
        [params["wq"].T * scale, params["wk"].T, params["wv"].T],
        axis=1).astype(compute_dtype)                                        # (D, 3*Dh)
    bqkv = jnp.concatenate(
        [params["bq"] * scale, params["bk"], params["bv"]],
        axis=1).astype(jnp.float32)                                          # (1, 3*Dh)
    wo_t = params["wo"].T.astype(compute_dtype)                              # (Dh, D)
    bo = params["bo"].astype(jnp.float32)                                    # (1, D)

    est = weight_bytes + block_b * per_row
    vmem_limit = int(min(max(2 * est, 32 * 1024 * 1024), int(0.85 * cap)))

    kern = functools.partial(_mha_kernel, num_heads=num_heads, d_kqv=d_kqv,
                             compute_dtype=compute_dtype,
                             approx_recip=(compute_dtype != jnp.float32))

    def build(single_buffer_weights):
        def const_spec(shape):
            idx_map = lambda b, _s=shape: (0,) * len(_s)
            if single_buffer_weights:
                # weights/biases never change block index -> single buffer
                return pl.BlockSpec(shape, idx_map, pipeline_mode=pl.Buffered(1))
            return pl.BlockSpec(shape, idx_map)

        return pl.pallas_call(
            kern,
            out_shape=jax.ShapeDtypeStruct((Bp, S, D), jnp.float32),
            grid_spec=pltpu.PrefetchScalarGridSpec(
                num_scalar_prefetch=0,
                grid=(Bp // block_b,),
                in_specs=[
                    pl.BlockSpec((block_b, S, D), lambda b: (b, 0, 0)),  # x block
                    const_spec((D, 3 * Dh)),     # fused QKV weight (compute dtype)
                    const_spec((1, 3 * Dh)),     # fused QKV bias (f32)
                    const_spec((Dh, D)),         # Wo (pre-transposed, compute dtype)
                    const_spec((1, D)),          # bo (f32)
                ],
                out_specs=pl.BlockSpec((block_b, S, D), lambda b: (b, 0, 0)),
                scratch_shapes=[pltpu.VMEM((block_b * S, Dh), compute_dtype)],
            ),
            compiler_params=pltpu.CompilerParams(
                dimension_semantics=("parallel",),
                vmem_limit_bytes=vmem_limit),
        )

    try:
        out = build(True)(x_in, wqkv_t, bqkv, wo_t, bo)
    except Exception:
        # fallback if this jax version rejects pipeline_mode=pl.Buffered(1)
        out = build(False)(x_in, wqkv_t, bqkv, wo_t, bo)

    return out if Bp == B else out[:B]


def _xavier_uniform(key, shape):
    fan_out, fan_in = shape
    limit = math.sqrt(6.0 / (fan_in + fan_out))
    return jax.random.uniform(key, shape, jnp.float32, -limit, limit)


def _reference(x, params, num_heads, d_kqv):
    """Pure-JAX reference mirroring the PyTorch forward (sanity check)."""
    def proj(t, w, b):
        return jnp.maximum(t @ w.T + b, 0.0)
    B, S, D = x.shape
    q = proj(x, params["wq"], params["bq"]).reshape(B, S, num_heads, d_kqv)
    k = proj(x, params["wk"], params["bk"]).reshape(B, S, num_heads, d_kqv)
    v = proj(x, params["wv"], params["bv"]).reshape(B, S, num_heads, d_kqv)
    s = jnp.einsum("bqhd,bkhd->bhqk", q, k) * d_kqv ** (-0.5)
    p = jax.nn.softmax(s, axis=-1)
    o = jnp.einsum("bhqk,bkhd->bqhd", p, v).reshape(B, S, num_heads * d_kqv)
    return jnp.maximum(o @ params["wo"].T + params["bo"], 0.0)


if __name__ == "__main__":
    # Small shapes consistent with the module's forward.
    # TODO(synk): production shapes should keep D and 3*Dh multiples of 128 and
    #             d_kqv lane-friendly; these demo sizes produce masked partial
    #             stores (correct, just not peak-throughput).
    B, S, d_model = 2, 8, 32
    num_heads, d_kqv = 4, 8
    Dh = num_heads * d_kqv

    key = jax.random.PRNGKey(0)
    kx, kq, kk, kv, ko, kb = jax.random.split(key, 6)
    kbq, kbk, kbv, kbo = jax.random.split(kb, 4)

    x = jax.random.normal(kx, (B, S, d_model), jnp.float32)
    params = {
        "wq": _xavier_uniform(kq, (Dh, d_model)),
        "bq": 0.1 * jax.random.normal(kbq, (1, Dh), jnp.float32),
        "wk": _xavier_uniform(kk, (Dh, d_model)),
        "bk": 0.1 * jax.random.normal(kbk, (1, Dh), jnp.float32),
        "wv": _xavier_uniform(kv, (Dh, d_model)),
        "bv": 0.1 * jax.random.normal(kbv, (1, Dh), jnp.float32),
        "wo": _xavier_uniform(ko, (d_model, Dh)),
        "bo": 0.1 * jax.random.normal(kbo, (1, d_model), jnp.float32),
    }

    ref = _reference(x, params, num_heads, d_kqv)

    # f32 compute path (exact reciprocal -> tight check; only assoc. error).
    out_f32 = multi_head_attention(x, params, num_heads=num_heads, d_kqv=d_kqv,
                                   compute_dtype=jnp.float32)
    out_f32 = jax.block_until_ready(out_f32)
    assert out_f32.shape == (B, S, d_model)
    assert jnp.allclose(out_f32, ref, atol=1e-3, rtol=1e-3)

    # default bf16-MXU-input / f32-accumulate path (the fast path).
    out_bf16 = multi_head_attention(x, params, num_heads=num_heads, d_kqv=d_kqv)
    out_bf16 = jax.block_until_ready(out_bf16)
    assert out_bf16.shape == (B, S, d_model)
    assert jnp.allclose(out_bf16, ref, atol=5e-2, rtol=5e-2)

    print("KERNEL_OK")
</pallas_src>

<mosaic_0001>
module attributes {stable_mosaic.version = 11 : i64} {
  func.func @_mha_kernel(%arg0: i32, %arg1: memref<1x8x32xf32, #tpu.memory_space<vmem>>, %arg2: memref<32x96xf32, #tpu.memory_space<vmem>>, %arg3: memref<1x96xf32, #tpu.memory_space<vmem>>, %arg4: memref<32x32xf32, #tpu.memory_space<vmem>>, %arg5: memref<1x32xf32, #tpu.memory_space<vmem>>, %arg6: memref<1x8x32xf32, #tpu.memory_space<vmem>>, %arg7: memref<8x32xf32, #tpu.memory_space<vmem>>) attributes {dimension_semantics = [#tpu.dimension_semantics<parallel>], iteration_bounds = array<i64: 2>, scalar_prefetch = 0 : i64, scratch_operands = 1 : i64, tpu.core_type = #tpu.core_type<tc>, window_params = [{transform_indices = @transform_0, window_bounds = array<i64: 1, 8, 32>}, {pipeline_mode = #tpu.pipeline_mode<synchronous>, transform_indices = @transform_1, window_bounds = array<i64: 32, 96>}, {pipeline_mode = #tpu.pipeline_mode<synchronous>, transform_indices = @transform_2, window_bounds = array<i64: 1, 96>}, {pipeline_mode = #tpu.pipeline_mode<synchronous>, transform_indices = @transform_3, window_bounds = array<i64: 32, 32>}, {pipeline_mode = #tpu.pipeline_mode<synchronous>, transform_indices = @transform_4, window_bounds = array<i64: 1, 32>}, {transform_indices = @transform_5, window_bounds = array<i64: 1, 8, 32>}]} {
    %c0 = arith.constant 0 : index
    %c0_0 = arith.constant 0 : index
    %c0_1 = arith.constant 0 : index
    %0 = vector.load %arg1[%c0, %c0_0, %c0_1] : memref<1x8x32xf32, #tpu.memory_space<vmem>>, vector<1x8x32xf32>
    %1 = vector.shape_cast %0 : vector<1x8x32xf32> to vector<8x32xf32>
    %c0_2 = arith.constant 0 : index
    %c0_3 = arith.constant 0 : index
    %2 = vector.load %arg2[%c0_2, %c0_3] : memref<32x96xf32, #tpu.memory_space<vmem>>, vector<32x96xf32>
    %cst = arith.constant dense<0.000000e+00> : vector<8x96xf32>
    %3 = tpu.matmul %1, %2, %cst {dimension_numbers = #tpu.dot_dimension_numbers<[1], [0], [0], [1], [0, 0, 1, 1], [], []>} : vector<8x32xf32>, vector<32x96xf32>, vector<8x96xf32> -> vector<8x96xf32>
    %c0_4 = arith.constant 0 : index
    %c0_5 = arith.constant 0 : index
    %4 = vector.load %arg3[%c0_4, %c0_5] : memref<1x96xf32, #tpu.memory_space<vmem>>, vector<1x96xf32>
    %5 = vector.broadcast %4 : vector<1x96xf32> to vector<8x96xf32>
    %6 = arith.addf %3, %5 : vector<8x96xf32>
    %cst_6 = arith.constant 0.000000e+00 : f32
    %7 = vector.broadcast %cst_6 : f32 to vector<8x96xf32>
    %8 = arith.maximumf %6, %7 : vector<8x96xf32>
    %9 = vector.extract_strided_slice %8 {offsets = [0, 0], sizes = [8, 8], strides = [1, 1]} : vector<8x96xf32> to vector<8x8xf32>
    %10 = vector.shape_cast %9 : vector<8x8xf32> to vector<1x8x8xf32>
    %11 = vector.extract_strided_slice %8 {offsets = [0, 32], sizes = [8, 8], strides = [1, 1]} : vector<8x96xf32> to vector<8x8xf32>
    %12 = vector.shape_cast %11 : vector<8x8xf32> to vector<1x8x8xf32>
    %13 = vector.extract_strided_slice %8 {offsets = [0, 64], sizes = [8, 8], strides = [1, 1]} : vector<8x96xf32> to vector<8x8xf32>
    %14 = vector.shape_cast %13 : vector<8x8xf32> to vector<1x8x8xf32>
    "tpu.trace_start"() <{level = 10 : i32, message = "bqd,bkd->bqk"}> : () -> ()
    %cst_7 = arith.constant dense<0.000000e+00> : vector<1x8x8xf32>
    %15 = tpu.matmul %10, %12, %cst_7 {dimension_numbers = #tpu.dot_dimension_numbers<[2], [2], [1], [1], [0, 0, 0, 1, 1, 1], [0], [0]>} : vector<1x8x8xf32>, vector<1x8x8xf32>, vector<1x8x8xf32> -> vector<1x8x8xf32>
    "tpu.trace_stop"() : () -> ()
    %cst_8 = arith.constant dense<0xFF800000> : vector<1x8xf32>
    %16 = vector.multi_reduction <maximumf>, %15, %cst_8 [2] : vector<1x8x8xf32> to vector<1x8xf32>
    %17 = vector.shape_cast %16 : vector<1x8xf32> to vector<1x8x1xf32>
    %18 = vector.broadcast %17 : vector<1x8x1xf32> to vector<1x8x8xf32>
    %19 = arith.subf %15, %18 : vector<1x8x8xf32>
    %20 = math.exp %19 : vector<1x8x8xf32>
    %cst_9 = arith.constant dense<0.000000e+00> : vector<1x8xf32>
    %21 = vector.multi_reduction <add>, %20, %cst_9 [2] : vector<1x8x8xf32> to vector<1x8xf32>
    %22 = vector.shape_cast %21 : vector<1x8xf32> to vector<1x8x1xf32>
    "tpu.trace_start"() <{level = 10 : i32, message = "bqk,bkd->bqd"}> : () -> ()
    %cst_10 = arith.constant dense<0.000000e+00> : vector<1x8x8xf32>
    %23 = tpu.matmul %20, %14, %cst_10 {dimension_numbers = #tpu.dot_dimension_numbers<[2], [1], [1], [2], [0, 0, 0, 1, 1, 2], [0], [0]>} : vector<1x8x8xf32>, vector<1x8x8xf32>, vector<1x8x8xf32> -> vector<1x8x8xf32>
    "tpu.trace_stop"() : () -> ()
    %cst_11 = arith.constant 1.000000e+00 : f32
    %24 = vector.broadcast %cst_11 : f32 to vector<1x8x1xf32>
    %25 = arith.divf %24, %22 : vector<1x8x1xf32>
    %26 = vector.broadcast %25 : vector<1x8x1xf32> to vector<1x8x8xf32>
    %27 = arith.mulf %23, %26 : vector<1x8x8xf32>
    %28 = vector.shape_cast %27 : vector<1x8x8xf32> to vector<8x8xf32>
    %c0_12 = arith.constant 0 : index
    %c0_13 = arith.constant 0 : index
    %29 = vector.load %arg7[%c0_12, %c0_13] : memref<8x32xf32, #tpu.memory_space<vmem>>, vector<8x8xf32>
    tpu.vector_store %arg7[%c0_12, %c0_13], %28 {strides = array<i32>} : memref<8x32xf32, #tpu.memory_space<vmem>>, vector<8x8xf32>,
    %30 = vector.extract_strided_slice %8 {offsets = [0, 8], sizes = [8, 8], strides = [1, 1]} : vector<8x96xf32> to vector<8x8xf32>
    %31 = vector.shape_cast %30 : vector<8x8xf32> to vector<1x8x8xf32>
    %32 = vector.extract_strided_slice %8 {offsets = [0, 40], sizes = [8, 8], strides = [1, 1]} : vector<8x96xf32> to vector<8x8xf32>
    %33 = vector.shape_cast %32 : vector<8x8xf32> to vector<1x8x8xf32>
    %34 = vector.extract_strided_slice %8 {offsets = [0, 72], sizes = [8, 8], strides = [1, 1]} : vector<8x96xf32> to vector<8x8xf32>
    %35 = vector.shape_cast %34 : vector<8x8xf32> to vector<1x8x8xf32>
    "tpu.trace_start"() <{level = 10 : i32, message = "bqd,bkd->bqk"}> : () -> ()
    %cst_14 = arith.constant dense<0.000000e+00> : vector<1x8x8xf32>
    %36 = tpu.matmul %31, %33, %cst_14 {dimension_numbers = #tpu.dot_dimension_numbers<[2], [2], [1], [1], [0, 0, 0, 1, 1, 1], [0], [0]>} : vector<1x8x8xf32>, vector<1x8x8xf32>, vector<1x8x8xf32> -> vector<1x8x8xf32>
    "tpu.trace_stop"() : () -> ()
    %cst_15 = arith.constant dense<0xFF800000> : vector<1x8xf32>
    %37 = vector.multi_reduction <maximumf>, %36, %cst_15 [2] : vector<1x8x8xf32> to vector<1x8xf32>
    %38 = vector.shape_cast %37 : vector<1x8xf32> to vector<1x8x1xf32>
    %39 = vector.broadcast %38 : vector<1x8x1xf32> to vector<1x8x8xf32>
    %40 = arith.subf %36, %39 : vector<1x8x8xf32>
    %41 = math.exp %40 : vector<1x8x8xf32>
    %cst_16 = arith.constant dense<0.000000e+00> : vector<1x8xf32>
    %42 = vector.multi_reduction <add>, %41, %cst_16 [2] : vector<1x8x8xf32> to vector<1x8xf32>
    %43 = vector.shape_cast %42 : vector<1x8xf32> to vector<1x8x1xf32>
    "tpu.trace_start"() <{level = 10 : i32, message = "bqk,bkd->bqd"}> : () -> ()
    %cst_17 = arith.constant dense<0.000000e+00> : vector<1x8x8xf32>
    %44 = tpu.matmul %41, %35, %cst_17 {dimension_numbers = #tpu.dot_dimension_numbers<[2], [1], [1], [2], [0, 0, 0, 1, 1, 2], [0], [0]>} : vector<1x8x8xf32>, vector<1x8x8xf32>, vector<1x8x8xf32> -> vector<1x8x8xf32>
    "tpu.trace_stop"() : () -> ()
    %cst_18 = arith.constant 1.000000e+00 : f32
    %45 = vector.broadcast %cst_18 : f32 to vector<1x8x1xf32>
    %46 = arith.divf %45, %43 : vector<1x8x1xf32>
    %47 = vector.broadcast %46 : vector<1x8x1xf32> to vector<1x8x8xf32>
    %48 = arith.mulf %44, %47 : vector<1x8x8xf32>
    %49 = vector.shape_cast %48 : vector<1x8x8xf32> to vector<8x8xf32>
    %c0_19 = arith.constant 0 : index
    %c8 = arith.constant 8 : index
    %50 = vector.load %arg7[%c0_19, %c8] : memref<8x32xf32, #tpu.memory_space<vmem>>, vector<8x8xf32>
    tpu.vector_store %arg7[%c0_19, %c8], %49 {strides = array<i32>} : memref<8x32xf32, #tpu.memory_space<vmem>>, vector<8x8xf32>,
    %51 = vector.extract_strided_slice %8 {offsets = [0, 16], sizes = [8, 8], strides = [1, 1]} : vector<8x96xf32> to vector<8x8xf32>
    %52 = vector.shape_cast %51 : vector<8x8xf32> to vector<1x8x8xf32>
    %53 = vector.extract_strided_slice %8 {offsets = [0, 48], sizes = [8, 8], strides = [1, 1]} : vector<8x96xf32> to vector<8x8xf32>
    %54 = vector.shape_cast %53 : vector<8x8xf32> to vector<1x8x8xf32>
    %55 = vector.extract_strided_slice %8 {offsets = [0, 80], sizes = [8, 8], strides = [1, 1]} : vector<8x96xf32> to vector<8x8xf32>
    %56 = vector.shape_cast %55 : vector<8x8xf32> to vector<1x8x8xf32>
    "tpu.trace_start"() <{level = 10 : i32, message = "bqd,bkd->bqk"}> : () -> ()
    %cst_20 = arith.constant dense<0.000000e+00> : vector<1x8x8xf32>
    %57 = tpu.matmul %52, %54, %cst_20 {dimension_numbers = #tpu.dot_dimension_numbers<[2], [2], [1], [1], [0, 0, 0, 1, 1, 1], [0], [0]>} : vector<1x8x8xf32>, vector<1x8x8xf32>, vector<1x8x8xf32> -> vector<1x8x8xf32>
    "tpu.trace_stop"() : () -> ()
    %cst_21 = arith.constant dense<0xFF800000> : vector<1x8xf32>
    %58 = vector.multi_reduction <maximumf>, %57, %cst_21 [2] : vector<1x8x8xf32> to vector<1x8xf32>
    %59 = vector.shape_cast %58 : vector<1x8xf32> to vector<1x8x1xf32>
    %60 = vector.broadcast %59 : vector<1x8x1xf32> to vector<1x8x8xf32>
    %61 = arith.subf %57, %60 : vector<1x8x8xf32>
    %62 = math.exp %61 : vector<1x8x8xf32>
    %cst_22 = arith.constant dense<0.000000e+00> : vector<1x8xf32>
    %63 = vector.multi_reduction <add>, %62, %cst_22 [2] : vector<1x8x8xf32> to vector<1x8xf32>
    %64 = vector.shape_cast %63 : vector<1x8xf32> to vector<1x8x1xf32>
    "tpu.trace_start"() <{level = 10 : i32, message = "bqk,bkd->bqd"}> : () -> ()
    %cst_23 = arith.constant dense<0.000000e+00> : vector<1x8x8xf32>
    %65 = tpu.matmul %62, %56, %cst_23 {dimension_numbers = #tpu.dot_dimension_numbers<[2], [1], [1], [2], [0, 0, 0, 1, 1, 2], [0], [0]>} : vector<1x8x8xf32>, vector<1x8x8xf32>, vector<1x8x8xf32> -> vector<1x8x8xf32>
    "tpu.trace_stop"() : () -> ()
    %cst_24 = arith.constant 1.000000e+00 : f32
    %66 = vector.broadcast %cst_24 : f32 to vector<1x8x1xf32>
    %67 = arith.divf %66, %64 : vector<1x8x1xf32>
    %68 = vector.broadcast %67 : vector<1x8x1xf32> to vector<1x8x8xf32>
    %69 = arith.mulf %65, %68 : vector<1x8x8xf32>
    %70 = vector.shape_cast %69 : vector<1x8x8xf32> to vector<8x8xf32>
    %c0_25 = arith.constant 0 : index
    %c16 = arith.constant 16 : index
    %71 = vector.load %arg7[%c0_25, %c16] : memref<8x32xf32, #tpu.memory_space<vmem>>, vector<8x8xf32>
    tpu.vector_store %arg7[%c0_25, %c16], %70 {strides = array<i32>} : memref<8x32xf32, #tpu.memory_space<vmem>>, vector<8x8xf32>,
    %72 = vector.extract_strided_slice %8 {offsets = [0, 24], sizes = [8, 8], strides = [1, 1]} : vector<8x96xf32> to vector<8x8xf32>
    %73 = vector.shape_cast %72 : vector<8x8xf32> to vector<1x8x8xf32>
    %74 = vector.extract_strided_slice %8 {offsets = [0, 56], sizes = [8, 8], strides = [1, 1]} : vector<8x96xf32> to vector<8x8xf32>
    %75 = vector.shape_cast %74 : vector<8x8xf32> to vector<1x8x8xf32>
    %76 = vector.extract_strided_slice %8 {offsets = [0, 88], sizes = [8, 8], strides = [1, 1]} : vector<8x96xf32> to vector<8x8xf32>
    %77 = vector.shape_cast %76 : vector<8x8xf32> to vector<1x8x8xf32>
    "tpu.trace_start"() <{level = 10 : i32, message = "bqd,bkd->bqk"}> : () -> ()
    %cst_26 = arith.constant dense<0.000000e+00> : vector<1x8x8xf32>
    %78 = tpu.matmul %73, %75, %cst_26 {dimension_numbers = #tpu.dot_dimension_numbers<[2], [2], [1], [1], [0, 0, 0, 1, 1, 1], [0], [0]>} : vector<1x8x8xf32>, vector<1x8x8xf32>, vector<1x8x8xf32> -> vector<1x8x8xf32>
    "tpu.trace_stop"() : () -> ()
    %cst_27 = arith.constant dense<0xFF800000> : vector<1x8xf32>
    %79 = vector.multi_reduction <maximumf>, %78, %cst_27 [2] : vector<1x8x8xf32> to vector<1x8xf32>
    %80 = vector.shape_cast %79 : vector<1x8xf32> to vector<1x8x1xf32>
    %81 = vector.broadcast %80 : vector<1x8x1xf32> to vector<1x8x8xf32>
    %82 = arith.subf %78, %81 : vector<1x8x8xf32>
    %83 = math.exp %82 : vector<1x8x8xf32>
    %cst_28 = arith.constant dense<0.000000e+00> : vector<1x8xf32>
    %84 = vector.multi_reduction <add>, %83, %cst_28 [2] : vector<1x8x8xf32> to vector<1x8xf32>
    %85 = vector.shape_cast %84 : vector<1x8xf32> to vector<1x8x1xf32>
    "tpu.trace_start"() <{level = 10 : i32, message = "bqk,bkd->bqd"}> : () -> ()
    %cst_29 = arith.constant dense<0.000000e+00> : vector<1x8x8xf32>
    %86 = tpu.matmul %83, %77, %cst_29 {dimension_numbers = #tpu.dot_dimension_numbers<[2], [1], [1], [2], [0, 0, 0, 1, 1, 2], [0], [0]>} : vector<1x8x8xf32>, vector<1x8x8xf32>, vector<1x8x8xf32> -> vector<1x8x8xf32>
    "tpu.trace_stop"() : () -> ()
    %cst_30 = arith.constant 1.000000e+00 : f32
    %87 = vector.broadcast %cst_30 : f32 to vector<1x8x1xf32>
    %88 = arith.divf %87, %85 : vector<1x8x1xf32>
    %89 = vector.broadcast %88 : vector<1x8x1xf32> to vector<1x8x8xf32>
    %90 = arith.mulf %86, %89 : vector<1x8x8xf32>
    %91 = vector.shape_cast %90 : vector<1x8x8xf32> to vector<8x8xf32>
    %c0_31 = arith.constant 0 : index
    %c24 = arith.constant 24 : index
    %92 = vector.load %arg7[%c0_31, %c24] : memref<8x32xf32, #tpu.memory_space<vmem>>, vector<8x8xf32>
    tpu.vector_store %arg7[%c0_31, %c24], %91 {strides = array<i32>} : memref<8x32xf32, #tpu.memory_space<vmem>>, vector<8x8xf32>,
    %c0_32 = arith.constant 0 : index
    %c0_33 = arith.constant 0 : index
    %93 = vector.load %arg7[%c0_32, %c0_33] : memref<8x32xf32, #tpu.memory_space<vmem>>, vector<8x32xf32>
    %c0_34 = arith.constant 0 : index
    %c0_35 = arith.constant 0 : index
    %94 = vector.load %arg4[%c0_34, %c0_35] : memref<32x32xf32, #tpu.memory_space<vmem>>, vector<32x32xf32>
    %cst_36 = arith.constant dense<0.000000e+00> : vector<8x32xf32>
    %95 = tpu.matmul %93, %94, %cst_36 {dimension_numbers = #tpu.dot_dimension_numbers<[1], [0], [0], [1], [0, 0, 1, 1], [], []>} : vector<8x32xf32>, vector<32x32xf32>, vector<8x32xf32> -> vector<8x32xf32>
    %c0_37 = arith.constant 0 : index
    %c0_38 = arith.constant 0 : index
    %96 = vector.load %arg5[%c0_37, %c0_38] : memref<1x32xf32, #tpu.memory_space<vmem>>, vector<1x32xf32>
    %97 = vector.broadcast %96 : vector<1x32xf32> to vector<8x32xf32>
    %98 = arith.addf %95, %97 : vector<8x32xf32>
    %cst_39 = arith.constant 0.000000e+00 : f32
    %99 = vector.broadcast %cst_39 : f32 to vector<8x32xf32>
    %100 = arith.maximumf %98, %99 : vector<8x32xf32>
    %101 = vector.shape_cast %100 : vector<8x32xf32> to vector<1x8x32xf32>
    %c0_40 = arith.constant 0 : index
    %c0_41 = arith.constant 0 : index
    %c0_42 = arith.constant 0 : index
    %102 = vector.load %arg6[%c0_40, %c0_41, %c0_42] : memref<1x8x32xf32, #tpu.memory_space<vmem>>, vector<1x8x32xf32>
    tpu.vector_store %arg6[%c0_40, %c0_41, %c0_42], %101 {strides = array<i32>} : memref<1x8x32xf32, #tpu.memory_space<vmem>>, vector<1x8x32xf32>,
    return
  }
  func.func @transform_0(%arg0: i32) -> (i32, i32, i32) {
    %c0_i32 = arith.constant 0 : i32
    %c0_i32_0 = arith.constant 0 : i32
    %c0_i32_1 = arith.constant 0 : i32
    return %arg0, %c0_i32, %c0_i32_0 : i32, i32, i32
  }
  func.func @transform_1(%arg0: i32) -> (i32, i32) {
    %c0_i32 = arith.constant 0 : i32
    %c0_i32_0 = arith.constant 0 : i32
    %c0_i32_1 = arith.constant 0 : i32
    return %c0_i32, %c0_i32_0 : i32, i32
  }
  func.func @transform_2(%arg0: i32) -> (i32, i32) {
    %c0_i32 = arith.constant 0 : i32
    %c0_i32_0 = arith.constant 0 : i32
    %c0_i32_1 = arith.constant 0 : i32
    return %c0_i32, %c0_i32_0 : i32, i32
  }
  func.func @transform_3(%arg0: i32) -> (i32, i32) {
    %c0_i32 = arith.constant 0 : i32
    %c0_i32_0 = arith.constant 0 : i32
    %c0_i32_1 = arith.constant 0 : i32
    return %c0_i32, %c0_i32_0 : i32, i32
  }
  func.func @transform_4(%arg0: i32) -> (i32, i32) {
    %c0_i32 = arith.constant 0 : i32
    %c0_i32_0 = arith.constant 0 : i32
    %c0_i32_1 = arith.constant 0 : i32
    return %c0_i32, %c0_i32_0 : i32, i32
  }
  func.func @transform_5(%arg0: i32) -> (i32, i32, i32) {
    %c0_i32 = arith.constant 0 : i32
    %c0_i32_0 = arith.constant 0 : i32
    %c0_i32_1 = arith.constant 0 : i32
    return %arg0, %c0_i32, %c0_i32_0 : i32, i32, i32
  }
}

module attributes {stable_mosaic.version = 11 : i64} {
  func.func @_mha_kernel(%arg0: i32, %arg1: memref<1x8x32xf32, #tpu.memory_space<vmem>>, %arg2: memref<32x96xf32, #tpu.memory_space<vmem>>, %arg3: memref<1x96xf32, #tpu.memory_space<vmem>>, %arg4: memref<32x32xf32, #tpu.memory_space<vmem>>, %arg5: memref<1x32xf32, #tpu.memory_space<vmem>>, %arg6: memref<1x8x32xf32, #tpu.memory_space<vmem>>, %arg7: memref<8x32xf32, #tpu.memory_space<vmem>>) attributes {dimension_semantics = [#tpu.dimension_semantics<parallel>], iteration_bounds = array<i64: 2>, scalar_prefetch = 0 : i64, scratch_operands = 1 : i64, tpu.core_type = #tpu.core_type<tc>, window_params = [{transform_indices = @transform_0, window_bounds = array<i64: 1, 8, 32>}, {pipeline_mode = #tpu.pipeline_mode<synchronous>, transform_indices = @transform_1, window_bounds = array<i64: 32, 96>}, {pipeline_mode = #tpu.pipeline_mode<synchronous>, transform_indices = @transform_2, window_bounds = array<i64: 1, 96>}, {pipeline_mode = #tpu.pipeline_mode<synchronous>, transform_indices = @transform_3, window_bounds = array<i64: 32, 32>}, {pipeline_mode = #tpu.pipeline_mode<synchronous>, transform_indices = @transform_4, window_bounds = array<i64: 1, 32>}, {transform_indices = @transform_5, window_bounds = array<i64: 1, 8, 32>}]} {
    %c0 = arith.constant 0 : index
    %c0_0 = arith.constant 0 : index
    %c0_1 = arith.constant 0 : index
    %0 = vector.load %arg1[%c0, %c0_0, %c0_1] : memref<1x8x32xf32, #tpu.memory_space<vmem>>, vector<1x8x32xf32>
    %1 = vector.shape_cast %0 : vector<1x8x32xf32> to vector<8x32xf32>
    %c0_2 = arith.constant 0 : index
    %c0_3 = arith.constant 0 : index
    %2 = vector.load %arg2[%c0_2, %c0_3] : memref<32x96xf32, #tpu.memory_space<vmem>>, vector<32x96xf32>
    %cst = arith.constant dense<0.000000e+00> : vector<8x96xf32>
    %3 = tpu.matmul %1, %2, %cst {dimension_numbers = #tpu.dot_dimension_numbers<[1], [0], [0], [1], [0, 0, 1, 1], [], []>} : vector<8x32xf32>, vector<32x96xf32>, vector<8x96xf32> -> vector<8x96xf32>
    %c0_4 = arith.constant 0 : index
    %c0_5 = arith.constant 0 : index
    %4 = vector.load %arg3[%c0_4, %c0_5] : memref<1x96xf32, #tpu.memory_space<vmem>>, vector<1x96xf32>
    %5 = vector.broadcast %4 : vector<1x96xf32> to vector<8x96xf32>
    %6 = arith.addf %3, %5 : vector<8x96xf32>
    %cst_6 = arith.constant 0.000000e+00 : f32
    %7 = vector.broadcast %cst_6 : f32 to vector<8x96xf32>
    %8 = arith.maximumf %6, %7 : vector<8x96xf32>
    %9 = vector.extract_strided_slice %8 {offsets = [0, 0], sizes = [8, 8], strides = [1, 1]} : vector<8x96xf32> to vector<8x8xf32>
    %10 = vector.shape_cast %9 : vector<8x8xf32> to vector<1x8x8xf32>
    %11 = vector.extract_strided_slice %8 {offsets = [0, 32], sizes = [8, 8], strides = [1, 1]} : vector<8x96xf32> to vector<8x8xf32>
    %12 = vector.shape_cast %11 : vector<8x8xf32> to vector<1x8x8xf32>
    %13 = vector.extract_strided_slice %8 {offsets = [0, 64], sizes = [8, 8], strides = [1, 1]} : vector<8x96xf32> to vector<8x8xf32>
    %14 = vector.shape_cast %13 : vector<8x8xf32> to vector<1x8x8xf32>
    "tpu.trace_start"() <{level = 10 : i32, message = "bqd,bkd->bqk"}> : () -> ()
    %cst_7 = arith.constant dense<0.000000e+00> : vector<1x8x8xf32>
    %15 = tpu.matmul %10, %12, %cst_7 {dimension_numbers = #tpu.dot_dimension_numbers<[2], [2], [1], [1], [0, 0, 0, 1, 1, 1], [0], [0]>} : vector<1x8x8xf32>, vector<1x8x8xf32>, vector<1x8x8xf32> -> vector<1x8x8xf32>
    "tpu.trace_stop"() : () -> ()
    %cst_8 = arith.constant dense<0xFF800000> : vector<1x8xf32>
    %16 = vector.multi_reduction <maximumf>, %15, %cst_8 [2] : vector<1x8x8xf32> to vector<1x8xf32>
    %17 = vector.shape_cast %16 : vector<1x8xf32> to vector<1x8x1xf32>
    %18 = vector.broadcast %17 : vector<1x8x1xf32> to vector<1x8x8xf32>
    %19 = arith.subf %15, %18 : vector<1x8x8xf32>
    %20 = math.exp %19 : vector<1x8x8xf32>
    %cst_9 = arith.constant dense<0.000000e+00> : vector<1x8xf32>
    %21 = vector.multi_reduction <add>, %20, %cst_9 [2] : vector<1x8x8xf32> to vector<1x8xf32>
    %22 = vector.shape_cast %21 : vector<1x8xf32> to vector<1x8x1xf32>
    "tpu.trace_start"() <{level = 10 : i32, message = "bqk,bkd->bqd"}> : () -> ()
    %cst_10 = arith.constant dense<0.000000e+00> : vector<1x8x8xf32>
    %23 = tpu.matmul %20, %14, %cst_10 {dimension_numbers = #tpu.dot_dimension_numbers<[2], [1], [1], [2], [0, 0, 0, 1, 1, 2], [0], [0]>} : vector<1x8x8xf32>, vector<1x8x8xf32>, vector<1x8x8xf32> -> vector<1x8x8xf32>
    "tpu.trace_stop"() : () -> ()
    %cst_11 = arith.constant 1.000000e+00 : f32
    %24 = vector.broadcast %cst_11 : f32 to vector<1x8x1xf32>
    %25 = arith.divf %24, %22 : vector<1x8x1xf32>
    %26 = vector.broadcast %25 : vector<1x8x1xf32> to vector<1x8x8xf32>
    %27 = arith.mulf %23, %26 : vector<1x8x8xf32>
    %28 = vector.shape_cast %27 : vector<1x8x8xf32> to vector<8x8xf32>
    %c0_12 = arith.constant 0 : index
    %c0_13 = arith.constant 0 : index
    %29 = vector.load %arg7[%c0_12, %c0_13] : memref<8x32xf32, #tpu.memory_space<vmem>>, vector<8x8xf32>
    tpu.vector_store %arg7[%c0_12, %c0_13], %28 {strides = array<i32>} : memref<8x32xf32, #tpu.memory_space<vmem>>, vector<8x8xf32>,
    %30 = vector.extract_strided_slice %8 {offsets = [0, 8], sizes = [8, 8], strides = [1, 1]} : vector<8x96xf32> to vector<8x8xf32>
    %31 = vector.shape_cast %30 : vector<8x8xf32> to vector<1x8x8xf32>
    %32 = vector.extract_strided_slice %8 {offsets = [0, 40], sizes = [8, 8], strides = [1, 1]} : vector<8x96xf32> to vector<8x8xf32>
    %33 = vector.shape_cast %32 : vector<8x8xf32> to vector<1x8x8xf32>
    %34 = vector.extract_strided_slice %8 {offsets = [0, 72], sizes = [8, 8], strides = [1, 1]} : vector<8x96xf32> to vector<8x8xf32>
    %35 = vector.shape_cast %34 : vector<8x8xf32> to vector<1x8x8xf32>
    "tpu.trace_start"() <{level = 10 : i32, message = "bqd,bkd->bqk"}> : () -> ()
    %cst_14 = arith.constant dense<0.000000e+00> : vector<1x8x8xf32>
    %36 = tpu.matmul %31, %33, %cst_14 {dimension_numbers = #tpu.dot_dimension_numbers<[2], [2], [1], [1], [0, 0, 0, 1, 1, 1], [0], [0]>} : vector<1x8x8xf32>, vector<1x8x8xf32>, vector<1x8x8xf32> -> vector<1x8x8xf32>
    "tpu.trace_stop"() : () -> ()
    %cst_15 = arith.constant dense<0xFF800000> : vector<1x8xf32>
    %37 = vector.multi_reduction <maximumf>, %36, %cst_15 [2] : vector<1x8x8xf32> to vector<1x8xf32>
    %38 = vector.shape_cast %37 : vector<1x8xf32> to vector<1x8x1xf32>
    %39 = vector.broadcast %38 : vector<1x8x1xf32> to vector<1x8x8xf32>
    %40 = arith.subf %36, %39 : vector<1x8x8xf32>
    %41 = math.exp %40 : vector<1x8x8xf32>
    %cst_16 = arith.constant dense<0.000000e+00> : vector<1x8xf32>
    %42 = vector.multi_reduction <add>, %41, %cst_16 [2] : vector<1x8x8xf32> to vector<1x8xf32>
    %43 = vector.shape_cast %42 : vector<1x8xf32> to vector<1x8x1xf32>
    "tpu.trace_start"() <{level = 10 : i32, message = "bqk,bkd->bqd"}> : () -> ()
    %cst_17 = arith.constant dense<0.000000e+00> : vector<1x8x8xf32>
    %44 = tpu.matmul %41, %35, %cst_17 {dimension_numbers = #tpu.dot_dimension_numbers<[2], [1], [1], [2], [0, 0, 0, 1, 1, 2], [0], [0]>} : vector<1x8x8xf32>, vector<1x8x8xf32>, vector<1x8x8xf32> -> vector<1x8x8xf32>
    "tpu.trace_stop"() : () -> ()
    %cst_18 = arith.constant 1.000000e+00 : f32
    %45 = vector.broadcast %cst_18 : f32 to vector<1x8x1xf32>
    %46 = arith.divf %45, %43 : vector<1x8x1xf32>
    %47 = vector.broadcast %46 : vector<1x8x1xf32> to vector<1x8x8xf32>
    %48 = arith.mulf %44, %47 : vector<1x8x8xf32>
    %49 = vector.shape_cast %48 : vector<1x8x8xf32> to vector<8x8xf32>
    %c0_19 = arith.constant 0 : index
    %c8 = arith.constant 8 : index
    %50 = vector.load %arg7[%c0_19, %c8] : memref<8x32xf32, #tpu.memory_space<vmem>>, vector<8x8xf32>
    tpu.vector_store %arg7[%c0_19, %c8], %49 {strides = array<i32>} : memref<8x32xf32, #tpu.memory_space<vmem>>, vector<8x8xf32>,
    %51 = vector.extract_strided_slice %8 {offsets = [0, 16], sizes = [8, 8], strides = [1, 1]} : vector<8x96xf32> to vector<8x8xf32>
    %52 = vector.shape_cast %51 : vector<8x8xf32> to vector<1x8x8xf32>
    %53 = vector.extract_strided_slice %8 {offsets = [0, 48], sizes = [8, 8], strides = [1, 1]} : vector<8x96xf32> to vector<8x8xf32>
    %54 = vector.shape_cast %53 : vector<8x8xf32> to vector<1x8x8xf32>
    %55 = vector.extract_strided_slice %8 {offsets = [0, 80], sizes = [8, 8], strides = [1, 1]} : vector<8x96xf32> to vector<8x8xf32>
    %56 = vector.shape_cast %55 : vector<8x8xf32> to vector<1x8x8xf32>
    "tpu.trace_start"() <{level = 10 : i32, message = "bqd,bkd->bqk"}> : () -> ()
    %cst_20 = arith.constant dense<0.000000e+00> : vector<1x8x8xf32>
    %57 = tpu.matmul %52, %54, %cst_20 {dimension_numbers = #tpu.dot_dimension_numbers<[2], [2], [1], [1], [0, 0, 0, 1, 1, 1], [0], [0]>} : vector<1x8x8xf32>, vector<1x8x8xf32>, vector<1x8x8xf32> -> vector<1x8x8xf32>
    "tpu.trace_stop"() : () -> ()
    %cst_21 = arith.constant dense<0xFF800000> : vector<1x8xf32>
    %58 = vector.multi_reduction <maximumf>, %57, %cst_21 [2] : vector<1x8x8xf32> to vector<1x8xf32>
    %59 = vector.shape_cast %58 : vector<1x8xf32> to vector<1x8x1xf32>
    %60 = vector.broadcast %59 : vector<1x8x1xf32> to vector<1x8x8xf32>
    %61 = arith.subf %57, %60 : vector<1x8x8xf32>
    %62 = math.exp %61 : vector<1x8x8xf32>
    %cst_22 = arith.constant dense<0.000000e+00> : vector<1x8xf32>
    %63 = vector.multi_reduction <add>, %62, %cst_22 [2] : vector<1x8x8xf32> to vector<1x8xf32>
    %64 = vector.shape_cast %63 : vector<1x8xf32> to vector<1x8x1xf32>
    "tpu.trace_start"() <{level = 10 : i32, message = "bqk,bkd->bqd"}> : () -> ()
    %cst_23 = arith.constant dense<0.000000e+00> : vector<1x8x8xf32>
    %65 = tpu.matmul %62, %56, %cst_23 {dimension_numbers = #tpu.dot_dimension_numbers<[2], [1], [1], [2], [0, 0, 0, 1, 1, 2], [0], [0]>} : vector<1x8x8xf32>, vector<1x8x8xf32>, vector<1x8x8xf32> -> vector<1x8x8xf32>
    "tpu.trace_stop"() : () -> ()
    %cst_24 = arith.constant 1.000000e+00 : f32
    %66 = vector.broadcast %cst_24 : f32 to vector<1x8x1xf32>
    %67 = arith.divf %66, %64 : vector<1x8x1xf32>
    %68 = vector.broadcast %67 : vector<1x8x1xf32> to vector<1x8x8xf32>
    %69 = arith.mulf %65, %68 : vector<1x8x8xf32>
    %70 = vector.shape_cast %69 : vector<1x8x8xf32> to vector<8x8xf32>
    %c0_25 = arith.constant 0 : index
    %c16 = arith.constant 16 : index
    %71 = vector.load %arg7[%c0_25, %c16] : memref<8x32xf32, #tpu.memory_space<vmem>>, vector<8x8xf32>
    tpu.vector_store %arg7[%c0_25, %c16], %70 {strides = array<i32>} : memref<8x32xf32, #tpu.memory_space<vmem>>, vector<8x8xf32>,
    %72 = vector.extract_strided_slice %8 {offsets = [0, 24], sizes = [8, 8], strides = [1, 1]} : vector<8x96xf32> to vector<8x8xf32>
    %73 = vector.shape_cast %72 : vector<8x8xf32> to vector<1x8x8xf32>
    %74 = vector.extract_strided_slice %8 {offsets = [0, 56], sizes = [8, 8], strides = [1, 1]} : vector<8x96xf32> to vector<8x8xf32>
    %75 = vector.shape_cast %74 : vector<8x8xf32> to vector<1x8x8xf32>
    %76 = vector.extract_strided_slice %8 {offsets = [0, 88], sizes = [8, 8], strides = [1, 1]} : vector<8x96xf32> to vector<8x8xf32>
    %77 = vector.shape_cast %76 : vector<8x8xf32> to vector<1x8x8xf32>
    "tpu.trace_start"() <{level = 10 : i32, message = "bqd,bkd->bqk"}> : () -> ()
    %cst_26 = arith.constant dense<0.000000e+00> : vector<1x8x8xf32>
    %78 = tpu.matmul %73, %75, %cst_26 {dimension_numbers = #tpu.dot_dimension_numbers<[2], [2], [1], [1], [0, 0, 0, 1, 1, 1], [0], [0]>} : vector<1x8x8xf32>, vector<1x8x8xf32>, vector<1x8x8xf32> -> vector<1x8x8xf32>
    "tpu.trace_stop"() : () -> ()
    %cst_27 = arith.constant dense<0xFF800000> : vector<1x8xf32>
    %79 = vector.multi_reduction <maximumf>, %78, %cst_27 [2] : vector<1x8x8xf32> to vector<1x8xf32>
    %80 = vector.shape_cast %79 : vector<1x8xf32> to vector<1x8x1xf32>
    %81 = vector.broadcast %80 : vector<1x8x1xf32> to vector<1x8x8xf32>
    %82 = arith.subf %78, %81 : vector<1x8x8xf32>
    %83 = math.exp %82 : vector<1x8x8xf32>
    %cst_28 = arith.constant dense<0.000000e+00> : vector<1x8xf32>
    %84 = vector.multi_reduction <add>, %83, %cst_28 [2] : vector<1x8x8xf32> to vector<1x8xf32>
    %85 = vector.shape_cast %84 : vector<1x8xf32> to vector<1x8x1xf32>
    "tpu.trace_start"() <{level = 10 : i32, message = "bqk,bkd->bqd"}> : () -> ()
    %cst_29 = arith.constant dense<0.000000e+00> : vector<1x8x8xf32>
    %86 = tpu.matmul %83, %77, %cst_29 {dimension_numbers = #tpu.dot_dimension_numbers<[2], [1], [1], [2], [0, 0, 0, 1, 1, 2], [0], [0]>} : vector<1x8x8xf32>, vector<1x8x8xf32>, vector<1x8x8xf32> -> vector<1x8x8xf32>
    "tpu.trace_stop"() : () -> ()
    %cst_30 = arith.constant 1.000000e+00 : f32
    %87 = vector.broadcast %cst_30 : f32 to vector<1x8x1xf32>
    %88 = arith.divf %87, %85 : vector<1x8x1xf32>
    %89 = vector.broadcast %88 : vector<1x8x1xf32> to vector<1x8x8xf32>
    %90 = arith.mulf %86, %89 : vector<1x8x8xf32>
    %91 = vector.shape_cast %90 : vector<1x8x8xf32> to vector<8x8xf32>
    %c0_31 = arith.constant 0 : index
    %c24 = arith.constant 24 : index
    %92 = vector.load %arg7[%c0_31, %c24] : memref<8x32xf32, #tpu.memory_space<vmem>>, vector<8x8xf32>
    tpu.vector_store %arg7[%c0_31, %c24], %91 {strides = array<i32>} : memref<8x32xf32, #tpu.memory_space<vmem>>, vector<8x8xf32>,
    %c0_32 = arith.constant 0 : index
    %c0_33 = arith.constant 0 : index
    %93 = vector.load %arg7[%c0_32, %c0_33] : memref<8x32xf32, #tpu.memory_space<vmem>>, vector<8x32xf32>
    %c0_34 = arith.constant 0 : index
    %c0_35 = arith.constant 0 : index
    %94 = vector.load %arg4[%c0_34, %c0_35] : memref<32x32xf32, #tpu.memory_space<vmem>>, vector<32x32xf32>
    %cst_36 = arith.constant dense<0.000000e+00> : vector<8x32xf32>
    %95 = tpu.matmul %93, %94, %cst_36 {dimension_numbers = #tpu.dot_dimension_numbers<[1], [0], [0], [1], [0, 0, 1, 1], [], []>} : vector<8x32xf32>, vector<32x32xf32>, vector<8x32xf32> -> vector<8x32xf32>
    %c0_37 = arith.constant 0 : index
    %c0_38 = arith.constant 0 : index
    %96 = vector.load %arg5[%c0_37, %c0_38] : memref<1x32xf32, #tpu.memory_space<vmem>>, vector<1x32xf32>
    %97 = vector.broadcast %96 : vector<1x32xf32> to vector<8x32xf32>
    %98 = arith.addf %95, %97 : vector<8x32xf32>
    %cst_39 = arith.constant 0.000000e+00 : f32
    %99 = vector.broadcast %cst_39 : f32 to vector<8x32xf32>
    %100 = arith.maximumf %98, %99 : vector<8x32xf32>
    %101 = vector.shape_cast %100 : vector<8x32xf32> to vector<1x8x32xf32>
    %c0_40 = arith.constant 0 : index
    %c0_41 = arith.constant 0 : index
    %c0_42 = arith.constant 0 : index
    %102 = vector.load %arg6[%c0_40, %c0_41, %c0_42] : memref<1x8x32xf32, #tpu.memory_space<vmem>>, vector<1x8x32xf32>
    tpu.vector_store %arg6[%c0_40, %c0_41, %c0_42], %101 {strides = array<i32>} : memref<1x8x32xf32, #tpu.memory_space<vmem>>, vector<1x8x32xf32>,
    return
  }
  func.func @transform_0(%arg0: i32) -> (i32, i32, i32) {
    %c0_i32 = arith.constant 0 : i32
    %c0_i32_0 = arith.constant 0 : i32
    %c0_i32_1 = arith.constant 0 : i32
    return %arg0, %c0_i32, %c0_i32_0 : i32, i32, i32
  }
  func.func @transform_1(%arg0: i32) -> (i32, i32) {
    %c0_i32 = arith.constant 0 : i32
    %c0_i32_0 = arith.constant 0 : i32
    %c0_i32_1 = arith.constant 0 : i32
    return %c0_i32, %c0_i32_0 : i32, i32
  }
  func.func @transform_2(%arg0: i32) -> (i32, i32) {
    %c0_i32 = arith.constant 0 : i32
    %c0_i32_0 = arith.constant 0 : i32
    %c0_i32_1 = arith.constant 0 : i32
    return %c0_i32, %c0_i32_0 : i32, i32
  }
  func.func @transform_3(%arg0: i32) -> (i32, i32) {
    %c0_i32 = arith.constant 0 : i32
    %c0_i32_0 = arith.constant 0 : i32
    %c0_i32_1 = arith.constant 0 : i32
    return %c0_i32, %c0_i32_0 : i32, i32
  }
  func.func @transform_4(%arg0: i32) -> (i32, i32) {
    %c0_i32 = arith.constant 0 : i32
    %c0_i32_0 = arith.constant 0 : i32
    %c0_i32_1 = arith.constant 0 : i32
    return %c0_i32, %c0_i32_0 : i32, i32
  }
  func.func @transform_5(%arg0: i32) -> (i32, i32, i32) {
    %c0_i32 = arith.constant 0 : i32
    %c0_i32_0 = arith.constant 0 : i32
    %c0_i32_1 = arith.constant 0 : i32
    return %arg0, %c0_i32, %c0_i32_0 : i32, i32, i32
  }
}

</mosaic_0001>

<bundles_post_ra>
// kernel: tpu_custom_call.1
= control target key start
LH: loop header
LB: loop body
LE: loop exit
PB: predicated region body
PF: predicated region fallthrough
CT: control target
= control target key end

     0   :  { %10 = vsyncpa [#allocation4], 0  ;;  %s1983_s0 = inlined_call_operand.hbm [shape: f32[2,8,32], index: 0, kind: input, shape index: {}]   ;;  %s1984_s1 = inlined_call_operand.hbm [shape: f32[32,96], index: 1, kind: input, shape index: {}]   ;;  %s1985_s2 = inlined_call_operand.vmem [shape: f32[1,96], index: 2, kind: input, shape index: {}]   ;;  %s1986_s3 = inlined_call_operand.hbm [shape: f32[32,32], index: 3, kind: input, shape index: {}]   ;;  %s1987_s4 = inlined_call_operand.vmem [shape: f32[1,32], index: 4, kind: input, shape index: {}]   ;;  %s1988_s5 = inlined_call_operand.hbm [shape: f32[2,8,32], index: 5, kind: output, shape index: {}]  }
   0x1   :  { %12 = vsyncpa [#allocation4 + $0x1], 0 }
   0x2   :  { %13 = vsyncpa [#allocation7], 0 }
   0x3   :  { %14 = vsyncpa [#allocation5], 0 }
   0x4   :  { %16 = vsyncpa [#allocation5 + $0x1], 0  ;;  %s1674_s18 = smov 0   ;;  %s1676_s19 = smov 0  }
   0x5   :  { %s1678_s20 = smov 0   ;;  %s1680_s21 = smov 0  }
   0x6 LB: > { %s1695_s22 = sadd.s32 4294967295, %s1619_s21   ;;  %s1229_s23 = sadd.s32 4294967294, %s1619_s21   ;;  %s1619_s21 = sphi %s1680_s21, %s2008_s21   ;;  %s1615_s20 = sphi %s1678_s20, %s2007_s20   ;;  %s1611_s19 = sphi %s1676_s19, %s2006_s19   ;;  %s1607_s18 = sphi %s1674_s18, %s2005_s18  }
   0x7   : > { %p42_p0 = scmp.ne.s32.totalorder %s1611_s19, %s1607_s18  ;;  %p1989_p1 = scmp.eq.s32.totalorder %s1695_s22, 0 }
   0x8   : > { %p156_p3 = scmp.eq.s32.totalorder %s1229_s23, 1  ;;  %p1230_p5 = scmp.ge.s32.totalorder %s1619_s21, 1 }
   0x9   : > { %p1704_p4 = por %p1989_p1, %p42_p0  ;;  %p163_p7 = scmp.lt.s32.totalorder %s1619_s21, 3 }
   0xa   : > { %p1709_p6 = por %p156_p3, %p42_p0  ;;  %s1621_s27 = smov [#allocation6]  }
   0xb   : > { %s1992_s24 = scalar_select %p1704_p4, 1, 0 }
   0xc   : > { %s1993_s25 = scalar_select %p1709_p6, 1, 0 }
   0xd   : > { %p1714_p8 = pnand %p1230_p5, %p163_p7  ;;  %s175_s28 = sshll.u32 %s1621_s27, 4  ;;  %s1718_s28 = int_to_ptr.vmem [resolvable:$true] %s175_s28 }
   0xe   : > { %s1622_s30 = smov [#allocation8]   ;;  %s1463_s9 = scalar_lea.hbm %s1984_s1, 512 }
   0xf   : > { %p1373_p9 = pneg %p1714_p8  ;;  %s191_s6 = sshll.u32 %s1622_s30, 4  ;;  %s1729_s6 = int_to_ptr.vmem [resolvable:$true] %s191_s6 }
  0x10   : > { %p1464_p12 = scmp.ne.s32.totalorder %s1984_s1, %s1463_s9  ;;  %p1470_p5 = scmp.lt.u32.totalorder %s1463_s9, %s1984_s1 }
  0x11   : > { %p1725_p11 = pnand %p1373_p9, %p1989_p1 }
  0x13   : > { %p1465_p13 = pneg %p1725_p11 }
  0x15   : > { %p1466_p0 = pnand %p1465_p13, %p1464_p12 }
  0x17   : > { %p1467_p3 = pneg %p1466_p0 }
  0x19   : > { %p1472_p7 = pnand %p1470_p5, %p1467_p3 }
  0x1b   : > { %1475 = shalt.err (!%p1472_p7)
}
  0x1c   : > { %s1476_s14 = scalar_lea.vmem %s1718_s28, 512  ;;  %p1484_p2 = scmp.lt.s32.totalorder %s1718_s28, %s1718_s28 }
  0x1d   : > { %p1477_p9 = scmp.ne.s32.totalorder %s1718_s28, %s1476_s14  ;;  %p1485_p12 = scmp.lt.s32.totalorder %s1476_s14, %s1476_s14 }
  0x1f   : > { %p1479_p10 = pnand %p1477_p9, %p1465_p13  ;;  %p1486_p0 = por %p1485_p12, %p1484_p2 }
  0x21   : > { %p1480_p1 = pneg %p1479_p10 }
  0x23   : > { %p1487_p6 = pnand %p1486_p0, %p1480_p1 }
  0x25   : > { %1490 = shalt.err (!%p1487_p6)
}
  0x26   : > { %s1623_s15 = smov 128   ;;  %s1624_s16 = smov 8  }
  0x27   : > { %1376 = dma.hbm_to_vmem [thread:$0]  (!%p1725_p11), %s1984_s1, 512, %s1718_s28, [#allocation7], %s1623_s15, %s1623_s15, %s1624_s16  }
  0x28   : > { %s1491_s7 = scalar_lea.hbm %s1986_s3, 512 }
  0x29   : > { %p1492_p2 = scmp.ne.s32.totalorder %s1986_s3, %s1491_s7  ;;  %p1498_p10 = scmp.lt.u32.totalorder %s1491_s7, %s1986_s3 }
  0x2b   : > { %p1494_p1 = pnand %p1492_p2, %p1465_p13 }
  0x2d   : > { %p1495_p6 = pneg %p1494_p1 }
  0x2f   : > { %p1500_p3 = pnand %p1498_p10, %p1495_p6 }
  0x31   : > { %1503 = shalt.err (!%p1500_p3)
}
  0x32   : > { %s1504_s28 = scalar_lea.vmem %s1729_s6, 512  ;;  %p1512_p12 = scmp.lt.s32.totalorder %s1729_s6, %s1729_s6 }
  0x33   : > { %p1505_p5 = scmp.ne.s32.totalorder %s1729_s6, %s1504_s28  ;;  %p1513_p0 = scmp.lt.s32.totalorder %s1504_s28, %s1504_s28 }
  0x35   : > { %p1507_p7 = pnand %p1505_p5, %p1465_p13  ;;  %p1514_p2 = por %p1513_p0, %p1512_p12 }
  0x37   : > { %p1508_p9 = pneg %p1507_p7 }
  0x39   : > { %p1515_p1 = pnand %p1514_p2, %p1508_p9 }
  0x3b   : > { %1518 = shalt.err (!%p1515_p1)
}
  0x3c   : > { %1379 = dma.hbm_to_vmem [thread:$0]  (!%p1725_p11), %s1986_s3, 512, %s1729_s6, [#allocation7], %s1623_s15, %s1623_s15, %s1624_s16  }
  0x3d   : > { %s1784_s14 = sadd.s32 1, %s1619_s21   ;;  %s29_s29 = sadd.s32 1, %s1615_s20 }
  0x3e   : > { %s26_s17 = ssub.s32 %s1619_s21, %s1784_s14  ;;  %p36_p13 = scmp.ne.s32.totalorder %s1615_s20, %s1611_s19 }
  0x3f   : > { %p27_p6 = scmp.eq.s32.totalorder %s26_s17, 0  ;;  %p37_p10 = scmp.eq.s32.totalorder %s1619_s21, 0 }
  0x40   : > { %p1996_p3 = scmp.eq.s32.totalorder %s1695_s22, 1  ;;  %p1390_p7 = scmp.lt.s32.totalorder %s1619_s21, 2 }
  0x41   : > { %s1800_s27 = scalar_select %p27_p6, %s1615_s20, %s29_s29  }
  0x42   : > { %p1794_p5 = por %p1996_p3, %p36_p13  ;;  %p38_p9 = por %p37_p10, %p36_p13 }
  0x43   : > { %s208_s30 = sand.u32 1, %s1615_s20   ;;  %s1235_s6 = sshll.u32 %s1619_s21, 7 }
  0x44   : > { %s1997_s23 = scalar_select %p1794_p5, 1, 0 }
  0x45   : > { %s1234_s7 = sshll.u32 %s208_s30, 3  ;;  %s1807_s8 = scalar_lea.hbm %s1983_s0, %s1235_s6 }
  0x46   : > { %s212_s9 = scalar_lea.vmem [#allocation3], %s1234_s7  ;;  %p1811_p11 = pnand %p1390_p7, %p38_p9 }
  0x47   : > { %s219_s10 = sshll.u32 %s212_s9, 4  ;;  %s209_s28 = scalar_lea.sflag [#allocation4], %s208_s30  ;;  %s1809_s10 = int_to_ptr.vmem [resolvable:$true] %s219_s10 }
  0x48   : > { %s1519_s12 = scalar_lea.hbm %s1807_s8, 128  ;;  %p1521_p0 = pneg %p1811_p11 }
  0x49   : > { %p1520_p12 = scmp.ne.s32.totalorder %s1807_s8, %s1519_s12  ;;  %s1524_s17 = scalar_lea.hbm %s1983_s0, 256 }
  0x4a   : > { %p1525_p13 = scmp.lt.u32.totalorder %s1807_s8, %s1983_s0  ;;  %p1526_p6 = scmp.lt.u32.totalorder %s1524_s17, %s1519_s12 }
  0x4b   : > { %p1522_p2 = pnand %p1521_p0, %p1520_p12  ;;  %p1528_p3 = scmp.lt.u32.totalorder %s1519_s12, %s1807_s8 }
  0x4c   : > { %p1527_p10 = por %p1526_p6, %p1525_p13 }
  0x4d   : > { %p1523_p1 = pneg %p1522_p2 }
  0x4e   : > { %p1529_p7 = por %p1528_p3, %p1527_p10 }
  0x50   : > { %p1530_p9 = pnand %p1529_p7, %p1523_p1 }
  0x52   : > { %1533 = shalt.err (!%p1530_p9)
}
  0x53   : > { %s1534_s30 = scalar_lea.vmem %s1809_s10, 128  ;;  %s1625_s15 = smov [#allocation3]  }
  0x54   : > { %p1535_p12 = scmp.ne.s32.totalorder %s1809_s10, %s1534_s30  ;;  %s1539_s16 = sshll.u32 %s1625_s15, 4  ;;  %s1540_s16 = int_to_ptr.vmem [resolvable:$false] %s1539_s16 }
  0x55   : > { %s1541_s9 = scalar_lea.vmem %s1540_s16, 256  ;;  %p1542_p4 = scmp.lt.s32.totalorder %s1809_s10, %s1540_s16 }
  0x56   : > { %p1537_p2 = pnand %p1535_p12, %p1521_p0  ;;  %p1543_p13 = scmp.lt.s32.totalorder %s1541_s9, %s1534_s30 }
  0x58   : > { %p1538_p5 = pneg %p1537_p2  ;;  %p1544_p6 = por %p1543_p13, %p1542_p4 }
  0x5a   : > { %p1545_p10 = pnand %p1544_p6, %p1538_p5 }
  0x5c   : > { %1548 = shalt.err (!%p1545_p10)
}
  0x5d   : > { %1383 = dma.hbm_to_vmem [thread:$0]  (!%p1811_p11), %s1807_s8, 128, %s1809_s10, %s209_s28  }
  0x5e   : > { %228 = sbr.rel (%p1714_p8) target bundleno = 1768 (0x6e8), region = 40  ;;  %s1843_s12 = sand.u32 (!%p1714_p8), 1, %s1611_s19  }
  0x5f   : > { %s1237_s13 = sshll.u32 (!%p1714_p8), %s1843_s12, 3  ;;  %s231_s29 = scalar_lea.sflag (!%p1714_p8), [#allocation4], %s1843_s12 }
  0x60   : > { %s234_s17 = scalar_lea.vmem (!%p1714_p8), [#allocation3], %s1237_s13  ;;  %p1999_p4 = scmp.ne.s32.totalorder (!%p1714_p8), %s1992_s24, 0 }
  0x65   : > { %1594 = dma.done.wait (%p1999_p4), %s231_s29, 128  }
  0x66   : > { %1596 = vsyncadd (%p1999_p4), %s231_s29, 4294967168  ;;  %p2000_p5 = scmp.eq.s32.totalorder %s1695_s22, 0 }
  0x68   : > { %1598 = dma.done.wait (%p2000_p5), [#allocation7], 1024   ;;  %p2001_p8 = pmov %p2000_p5 }
  0x69   : > { %v1626_v0 = vmov 0.0|0.0   ;;  %vm1627_vm0 = vmmov 0   ;;  %v1628_v1 = vmov 0.0   ;;  %v270_v2 = vld [vmem:[#allocation6] sm:$0xff]  ;;  %v271_v3 = vld [vmem:[#allocation6 + $0x8] sm:$0xff]  ;;  %v272_v4 = vld [vmem:[#allocation6 + $0x10] sm:$0xff] }
  0x6a   : > { %1600 = vsyncadd (%p2001_p8), [#allocation7], 4294966272  ;;  %1349 = vmatprep.subr.bf16.mxu0 %v1626_v0  ;;  %1295 = vmatprep.mubr.msk.f32.mxu0 %vm1627_vm0, %v1628_v1  ;;  %v1350_v5 = vpack.c.bf16 %v271_v3, %v270_v2  ;;  %v273_v6 = vld [vmem:[#allocation6 + $0x18] sm:$0xff]  ;;  %vm281_vm1 = vcmask 261120   ;;  %v1241_v9 = vld [vmem:[%s1985_s2] ss:$0 sm:$0xff] }
  0x6b   : > { %1298 = vmatprep.subr.mxu1 %v1628_v1  ;;  %1300 = vmatprep.mubr.msk.f32.mxu1 %vm1627_vm0, %v1628_v1  ;;  %v1353_v7 = vpack.c.bf16 %v273_v6, %v272_v4  ;;  %v269_v8 = vld [vmem:[%s234_s17] sm:$0xff]  ;;  %s1629_s8 = smov 64   ;;  %s1630_s10 = smov 96   ;;  %vm359_vm2 = vcmask 64512   ;;  %v1040_v3 = vld [vmem:[#allocation8] sm:$0xff]  ;;  %v1041_v4 = vld [vmem:[#allocation8 + $0x8] sm:$0xff] }
  0x6c   : > { %1351 = vmatpush3.bf16.msra.mxu0 %v1350_v5  ;;  %s1631_s11 = smov 88   ;;  %s1632_s28 = smov 120   ;;  %v1042_v5 = vld [vmem:[#allocation8 + $0x10] sm:$0xff]  ;;  %v1043_v6 = vld [vmem:[#allocation8 + $0x18] sm:$0xff]  ;;  %vm693_vm3 = vcmask 130112   ;;  %vm865_vm4 = vcmask 195712  }
  0x6d   : > { %1352 = vmatprep.subr.bf16.mxu0 %v1626_v0  ;;  %s1633_s7 = smov 80   ;;  %s1634_s6 = smov 112   ;;  %vm1037_vm5 = vcmask 261312  }
  0x6e   : > { %s1635_s30 = smov 72   ;;  %s1636_s15 = smov 104  }
  0x6f   : > { %s1637_s16 = smov 56   ;;  %s1638_s9 = smov 40  }
  0x70   : > { %1354 = vmatpush3.bf16.msra.mxu0 %v1353_v7  ;;  %s1639_s29 = smov 48   ;;  %s1640_s17 = smov 8  }
  0x71   : > { %1318 = vmatprep.subr.mxu0 %v1628_v1  ;;  %s1641_s24 = smov 16   ;;  %s1642_s26 = smov 24  }
  0x72   : > { %p2002_p0 = scmp.ne.s32.totalorder %s1997_s23, 0 }
  0x73   : > { %1296 = vmatmul.mubr.msk.f32.vlgmr.msra.gmra.mrb[0].mxu0 %vm281_vm1, %v269_v8 }
  0x74   : > { %1320 = vmatprep.mubr.msk.f32.mxu0 %vm1627_vm0, %v1628_v1 }
 0x146   : > { %v351_v10 = vpop.f32.mrb[0].mxu0 }
 0x147   : > { %v352_v11 = vadd.f32 %v1241_v9, %v351_v10  ;;  %v1297_v12 = vpop.f32.mrb[1].mxu0  ;;  %v1359_v9 = vpack.c.bf16 %v1043_v6, %v1042_v5 }
 0x149   : > { %v1871_v13 = vmax.f32 %v352_v11, 0.0 }
 0x14b   : > { %443 = vrot.lane.b32.xlu1 %v1871_v13, %s1629_s8  ;;  %357 = vrot.lane.b32.xlu0 %v1871_v13, %s1630_s10 }
 0x14f   : > { %525 = vrot.lane.b32.xlu1 %v1871_v13, %s1631_s11  ;;  %s1258_s11 = sshll.u32 %s1695_s22, 7 }
 0x153   : > { %523 = vrot.lane.b32.xlu1 %v1871_v13, %s1632_s28  ;;  %s268_s28 = scalar_lea.vmem [#allocation9], %s1237_s13  ;;  %s1643_s13 = smov [#allocation9]  }
 0x157   : > { %697 = vrot.lane.b32.xlu1 %v1871_v13, %s1633_s7  ;;  %s1140_s7 = sshll.u32 %s268_s28, 4  ;;  %s1940_s7 = int_to_ptr.vmem [resolvable:$true] %s1140_s7 }
 0x158   : > { %s1549_s22 = scalar_lea.vmem %s1940_s7, 128 }
 0x159   : > { %p1550_p11 = scmp.ne.s32.totalorder %s1940_s7, %s1549_s22 }
 0x15b   : > { %695 = vrot.lane.b32.xlu1 %v1871_v13, %s1634_s6  ;;  %p1551_p1 = pnand %p1550_p11, %p2002_p0 }
 0x15d   : > { %p1552_p3 = pneg %p1551_p1 }
 0x15f   : > { %869 = vrot.lane.b32.xlu1 %v1871_v13, %s1635_s30 }
 0x163   : > { %867 = vrot.lane.b32.xlu1 %v1871_v13, %s1636_s15  ;;  %s1938_s15 = scalar_lea.hbm %s1988_s5, %s1258_s11 }
 0x1bd   : > { %v444_v14 = vpop.permute.xlu1 %443  ;;  %v358_v15 = vpop.permute.xlu0 %357 }
 0x1be   : > { %1299 = vmatpush3.xpose.msk.msra.mxu1 %vm359_vm2, %v358_v15 }
 0x1bf   : > { %1303 = vmatprep.subr.mxu1 %v1628_v1 }
 0x1c1   : > { %v526_v16 = vpop.permute.xlu1 %525  ;;  %1301 = vmatmul.mubr.msk.f32.vlgmr.msra.gmra.mrb[0].mxu1 %vm359_vm2, %v1871_v13 }
 0x1c2   : > { %1304 = vmatpush3.msra.mxu1 %v444_v14  ;;  %1305 = vmatprep.mubr.msk.f32.mxu1 %vm1627_vm0, %v1628_v1 }
 0x1c3   : > { %1308 = vmatprep.subr.mxu1 %v1628_v1 }
 0x1c5   : > { %v524_v17 = vpop.permute.xlu1 %523 }
 0x1c9   : > { %v698_v18 = vpop.permute.xlu1 %697 }
 0x1ca   : > { %1319 = vmatpush3.xpose.msk.msra.mxu0 %vm359_vm2, %v698_v18 }
 0x1cb   : > { %1328 = vmatprep.subr.mxu0 %v1628_v1 }
 0x1cd   : > { %v696_v19 = vpop.permute.xlu1 %695 }
 0x1ce   : > { %1321 = vmatmul.mubr.msk.f32.vlgmr.msra.gmra.mrb[2].mxu0 %vm359_vm2, %v696_v19 }
 0x1cf   : > { %1330 = vmatprep.mubr.msk.f32.mxu0 %vm1627_vm0, %v1628_v1 }
 0x1d1   : > { %v870_v20 = vpop.permute.xlu1 %869 }
 0x1d2   : > { %1329 = vmatpush3.xpose.msk.msra.mxu0 %vm359_vm2, %v870_v20 }
 0x1d3   : > { %1355 = vmatprep.subr.bf16.mxu0 %v1626_v0 }
 0x1d5   : > { %v868_v21 = vpop.permute.xlu1 %867 }
 0x1d6   : > { %1331 = vmatmul.mubr.msk.f32.vlgmr.msra.gmra.mrb[4].mxu0 %vm359_vm2, %v868_v21 }
 0x1d7   : > { %1346 = vmatprep.mubr.msk.f32.mxu0 %vm1627_vm0, %v1628_v1 }
 0x294   : > { %v430_v22 = vpop.f32.mrb[0].mxu1 }
 0x295   : > { %v1302_v23 = vpop.f32.mrb[1].mxu1  ;;  %v434_v24 = vsel %vm359_vm2, %v430_v22, -inf }
 0x296   : > { %435 = vmax.xlane.f32.xlu0 %v434_v24  ;;  %v1255_v23 = vld [vmem:[%s1987_s4] ss:$0 sm:$0xff] }
 0x2a1   : > { %v769_v25 = vpop.f32.mrb[2].mxu0 }
 0x2a2   : > { %v1322_v26 = vpop.f32.mrb[3].mxu0  ;;  %v773_v29 = vsel %vm359_vm2, %v769_v25, -inf }
 0x2a9   : > { %v941_v27 = vpop.f32.mrb[4].mxu0 }
 0x2aa   : > { %v1332_v28 = vpop.f32.mrb[5].mxu0  ;;  %v945_v30 = vsel %vm359_vm2, %v941_v27, -inf }
 0x2ac   : > { %610 = vrot.lane.b32.xlu0 %v1871_v13, %s1637_s16  ;;  %s1127_s16 = scalar_lea.sflag [#allocation5], %s1843_s12 }
 0x2cb   : > { %774 = vmax.xlane.f32.xlu0 %v773_v29 }
 0x2cf   : > { %946 = vmax.xlane.f32.xlu0 %v945_v30 }
 0x2e5   : > { %954 = vrot.lane.b32.xlu0 %v1871_v13, %s1638_s9  ;;  %s1553_s9 = sshll.u32 %s1643_s13, 4  ;;  %s1554_s9 = int_to_ptr.vmem [resolvable:$false] %s1553_s9 }
 0x2e6   : > { %p1556_p7 = scmp.lt.s32.totalorder %s1940_s7, %s1554_s9 }
 0x323   : > { %v436_v31 = vpop.xlane.xlu0 %435 }
 0x324   : > { %v437_v32 = vsub.f32 %v430_v22, %v436_v31 }
 0x326   : > { %v438_v33 = vmul.f32 1.442695, %v437_v32 }
 0x327   : > { %v611_v35 = vpop.permute.xlu0 %610 }
 0x328   : > { %1447 = vpow2.f32 %v438_v33 }
 0x332   : > { %v1448_v34 = vpop.eup %1447 }
 0x333   : > { %1306 = vmatmul.mubr.msk.f32.vlgmr.msra.gmra.mrb[2].mxu1 %vm359_vm2, %v1448_v34  ;;  %v440_v58 = vsel %vm359_vm2, %v1448_v34, 0.0 }
 0x334   : > { %1309 = vmatpush3.xpose.msk.msra.mxu1 %vm359_vm2, %v526_v16  ;;  %1310 = vmatprep.mubr.msk.f32.mxu1 %vm1627_vm0, %v1628_v1 }
 0x335   : > { %1313 = vmatprep.subr.mxu1 %v1628_v1 }
 0x337   : > { %1311 = vmatmul.mubr.msk.f32.vlgmr.msra.gmra.mrb[4].mxu1 %vm359_vm2, %v524_v17 }
 0x338   : > { %1314 = vmatpush3.msra.mxu1 %v611_v35  ;;  %1315 = vmatprep.mubr.msk.f32.mxu1 %vm1627_vm0, %v1628_v1 }
 0x339   : > { %1323 = vmatprep.subr.mxu1 %v1628_v1 }
 0x358   : > { %v775_v41 = vpop.xlane.xlu0 %774 }
 0x359   : > { %v776_v42 = vsub.f32 %v769_v25, %v775_v41 }
 0x35b   : > { %v777_v43 = vmul.f32 1.442695, %v776_v42 }
 0x35c   : > { %v947_v46 = vpop.xlane.xlu0 %946 }
 0x35d   : > { %1449 = vpow2.f32 %v777_v43  ;;  %v948_v47 = vsub.f32 %v941_v27, %v947_v46 }
 0x35f   : > { %v949_v50 = vmul.f32 1.442695, %v948_v47 }
 0x360   : > { %v955_v56 = vpop.permute.xlu0 %954 }
 0x367   : > { %v1450_v44 = vpop.eup %1449 }
 0x368   : > { %v779_v45 = vsel %vm359_vm2, %v1450_v44, 0.0 }
 0x406   : > { %v515_v36 = vpop.f32.mrb[2].mxu1 }
 0x407   : > { %v1307_v37 = vpop.f32.mrb[3].mxu1 }
 0x40a   : > { %v597_v38 = vpop.f32.mrb[4].mxu1 }
 0x40b   : > { %v1312_v39 = vpop.f32.mrb[5].mxu1  ;;  %v601_v40 = vsel %vm359_vm2, %v597_v38, -inf }
 0x40c   : > { %602 = vmax.xlane.f32.xlu1 %v601_v40 }
 0x41d   : > { %782 = vrot.lane.b32.xlu1 %v1871_v13, %s1639_s29  ;;  %s1555_s29 = scalar_lea.vmem %s1554_s9, 256 }
 0x41e   : > { %p1557_p9 = scmp.lt.s32.totalorder %s1555_s29, %s1549_s22 }
 0x420   : > { %p1558_p12 = por %p1557_p9, %p1556_p7 }
 0x422   : > { %p1559_p2 = pnand %p1558_p12, %p1552_p3 }
 0x441   : > { %780 = vadd.xlane.f32.xlu1 %v779_v45 }
 0x499   : > { %v603_v48 = vpop.xlane.xlu1 %602 }
 0x49a   : > { %v604_v49 = vsub.f32 %v597_v38, %v603_v48 }
 0x49c   : > { %v605_v51 = vmul.f32 1.442695, %v604_v49 }
 0x49d   : > { %v783_v53 = vpop.permute.xlu1 %782 }
 0x49e   : > { %1451 = vpow2.f32 %v605_v51 }
 0x49f   : > { %1453 = vpow2.f32 %v949_v50 }
 0x4a8   : > { %v1452_v52 = vpop.eup %1451 }
 0x4a9   : > { %1316 = vmatmul.mubr.msk.f32.vlgmr.msra.gmra.mrb[6].mxu1 %vm359_vm2, %v1452_v52  ;;  %v607_v54 = vsel %vm359_vm2, %v1452_v52, 0.0  ;;  %v1454_v55 = vpop.eup %1453 }
 0x4aa   : > { %1324 = vmatpush3.msra.mxu1 %v783_v53  ;;  %608 = vadd.xlane.f32.xlu0 %v607_v54  ;;  %v951_v57 = vsel %vm359_vm2, %v1454_v55, 0.0 }
 0x4ab   : > { %1325 = vmatprep.mubr.msk.f32.mxu1 %vm1627_vm0, %v1628_v1  ;;  %1333 = vmatprep.subr.mxu1 %v1628_v1 }
 0x4ad   : > { %1326 = vmatmul.mubr.msk.f32.vlgmr.msra.gmra.mrb[8].mxu1 %vm359_vm2, %v1450_v44 }
 0x4ae   : > { %1334 = vmatpush3.msra.mxu1 %v955_v56  ;;  %952 = vadd.xlane.f32.xlu0 %v951_v57 }
 0x4af   : > { %1335 = vmatprep.mubr.msk.f32.mxu1 %vm1627_vm0, %v1628_v1  ;;  %v1356_v1 = vpack.c.bf16 %v1041_v4, %v1040_v3 }
 0x4b1   : > { %1336 = vmatmul.mubr.msk.f32.vlgmr.msra.gmra.mrb[10].mxu1 %vm359_vm2, %v1454_v55  ;;  %1357 = vmatpush3.bf16.msra.mxu0 %v1356_v1 }
 0x4b2   : > { %441 = vadd.xlane.f32.xlu0 %v440_v58  ;;  %1358 = vmatprep.subr.bf16.mxu0 %v1626_v0 }
 0x4b5   : > { %1360 = vmatpush3.bf16.msra.mxu0 %v1359_v9 }
 0x4ce   : > { %v781_v2 = vpop.xlane.xlu1 %780 }
 0x537   : > { %v609_v59 = vpop.xlane.xlu0 %608 }
 0x53b   : > { %v953_v60 = vpop.xlane.xlu0 %952 }
 0x53f   : > { %v442_v61 = vpop.xlane.xlu0 %441 }
 0x540   : > { %1455 = vrcp.f32 %v442_v61 }
 0x541   : > { %1457 = vrcp.f32 %v609_v59 }
 0x542   : > { %1459 = vrcp.f32 %v781_v2 }
 0x543   : > { %1461 = vrcp.f32 %v953_v60 }
 0x54a   : > { %v1456_v62 = vpop.eup %1455 }
 0x54b   : > { %v521_v63 = vmul.f32 %v1456_v62, %v515_v36  ;;  %v1458_v7 = vpop.eup %1457 }
 0x54c   : > { %v1460_v12 = vpop.eup %1459 }
 0x54d   : > { %522 = vst.msk [vmem:[#allocation2] sm:$0xff] %vm359_vm2, %v521_v63  ;;  %v1462_v16 = vpop.eup %1461 }
 0x57c   : > { %v682_v8 = vpop.f32.mrb[6].mxu1 }
 0x57d   : > { %v688_v10 = vmul.f32 %v1458_v7, %v682_v8  ;;  %v1317_v11 = vpop.f32.mrb[7].mxu1 }
 0x57f   : > { %690 = vrot.lane.b32.xlu0 %v688_v10, %s1640_s17 }
 0x580   : > { %v854_v13 = vpop.f32.mrb[8].mxu1 }
 0x581   : > { %v860_v14 = vmul.f32 %v1460_v12, %v854_v13  ;;  %v1327_v15 = vpop.f32.mrb[9].mxu1 }
 0x583   : > { %862 = vrot.lane.b32.xlu1 %v860_v14, %s1641_s24 }
 0x584   : > { %v1026_v17 = vpop.f32.mrb[10].mxu1 }
 0x585   : > { %v1032_v18 = vmul.f32 %v1462_v16, %v1026_v17  ;;  %v1337_v19 = vpop.f32.mrb[11].mxu1 }
 0x587   : > { %1034 = vrot.lane.b32.xlu0 %v1032_v18, %s1642_s26 }
 0x5f1   : > { %v691_v20 = vpop.permute.xlu0 %690 }
 0x5f2   : > { %694 = vst.msk [vmem:[#allocation2] sm:$0xff] %vm693_vm3, %v691_v20 }
 0x5f5   : > { %v863_v0 = vpop.permute.xlu1 %862 }
 0x5f6   : > { %866 = vst.msk [vmem:[#allocation2] sm:$0xff] %vm865_vm4, %v863_v0 }
 0x5f9   : > { %v1035_v21 = vpop.permute.xlu0 %1034 }
 0x5fa   : > { %1038 = vst.msk [vmem:[#allocation2] sm:$0xff] %vm1037_vm5, %v1035_v21 }
 0x601   : > { %v1039_v22 = vld [vmem:[#allocation2] sm:$0xff] }
 0x602   : > { %1347 = vmatmul.mubr.msk.f32.vlgmr.msra.gmra.mrb[6].mxu0 %vm281_vm1, %v1039_v22 }
 0x6d5   : > { %v1120_v24 = vpop.f32.mrb[6].mxu0 }
 0x6d6   : > { %v1121_v25 = vadd.f32 %v1255_v23, %v1120_v24  ;;  %v1348_v26 = vpop.f32.mrb[7].mxu0 }
 0x6d8   : > { %v1124_v27 = vmax.f32 %v1121_v25, 0.0 }
 0x6da   : > { %1125 = vst.msk [vmem:[%s268_s28] sm:$0xff] %vm281_vm1, %v1124_v27 }
 0x6db   : > { %1562 = shalt.err (!%p1559_p2)
}
 0x6dc   : > { %s1563_s12 = scalar_lea.hbm %s1938_s15, 128  ;;  %s1567_s26 = scalar_lea.hbm %s1988_s5, 256 }
 0x6dd   : > { %p1564_p13 = scmp.ne.s32.totalorder %s1938_s15, %s1563_s12  ;;  %p1568_p4 = scmp.lt.u32.totalorder %s1938_s15, %s1988_s5 }
 0x6de   : > { %p1569_p5 = scmp.lt.u32.totalorder %s1567_s26, %s1563_s12  ;;  %p1571_p11 = scmp.lt.u32.totalorder %s1563_s12, %s1938_s15 }
 0x6df   : > { %p1565_p6 = pnand %p1564_p13, %p2002_p0 }
 0x6e0   : > { %p1570_p8 = por %p1569_p5, %p1568_p4 }
 0x6e1   : > { %p1566_p10 = pneg %p1565_p6 }
 0x6e2   : > { %p1572_p1 = por %p1571_p11, %p1570_p8 }
 0x6e4   : > { %p1573_p3 = pnand %p1572_p1, %p1566_p10 }
 0x6e6   : > { %1576 = shalt.err (!%p1573_p3)
}
 0x6e7   : > { %1371 = dma.vmem_to_hbm [thread:$0]  (%p2002_p0), %s1940_s7, 128, %s1938_s15, %s1127_s16  }
 0x6e8 PF: > { %s1152_s11 = sand.u32 1, %s1607_s18   ;;  %p2003_p7 = scmp.ne.s32.totalorder %s1993_s25, 0 }
 0x6e9   : > { %p2004_p9 = scmp.ge.s32.totalorder %s1619_s21, 2  ;;  %s1153_s28 = scalar_lea.sflag [#allocation5], %s1152_s11 }
 0x6eb   : > { %p1385_p12 = pnand %p2004_p9, %p2003_p7 }
 0x6ed   : > { %1602 = dma.done.wait (!%p1385_p12), %s1153_s28, 128  }
 0x6ee   : > { %1604 = vsyncadd (!%p1385_p12), %s1153_s28, 4294967168  ;;  %p19_p2 = scmp.ge.s32.totalorder %s1784_s14, 4   ;;  %s2005_s18 = smov %s1611_s19 }
 0x6ef   : > { %s2006_s19 = smov %s1615_s20  ;;  %s2007_s20 = smov %s1800_s27 }
 0x6f0   : > { %s2008_s21 = smov %s1784_s14  ;;  %21 = sbr.rel (!%p19_p2) target bundleno = 6 (0x6), region = 93 }
 0x6f7   :  { %1158 = vsyncpa [#allocation4], 1 }
 0x6f8   :  { %1160 = vsyncpa [#allocation4 + $0x1], 1 }
 0x6f9   :  { %1161 = vsyncpa [#allocation7], 1 }
 0x6fa   :  { %1162 = vsyncpa [#allocation5], 1 }
 0x6fb   :  { %1164 = vsyncpa [#allocation5 + $0x1], 1 }

// kernel: tpu_custom_call.1
= control target key start
LH: loop header
LB: loop body
LE: loop exit
PB: predicated region body
PF: predicated region fallthrough
CT: control target
= control target key end

     0   :  { %10 = vsyncpa [#allocation4], 0  ;;  %s1983_s0 = inlined_call_operand.hbm [shape: f32[2,8,32], index: 0, kind: input, shape index: {}]   ;;  %s1984_s1 = inlined_call_operand.hbm [shape: f32[32,96], index: 1, kind: input, shape index: {}]   ;;  %s1985_s2 = inlined_call_operand.vmem [shape: f32[1,96], index: 2, kind: input, shape index: {}]   ;;  %s1986_s3 = inlined_call_operand.hbm [shape: f32[32,32], index: 3, kind: input, shape index: {}]   ;;  %s1987_s4 = inlined_call_operand.vmem [shape: f32[1,32], index: 4, kind: input, shape index: {}]   ;;  %s1988_s5 = inlined_call_operand.hbm [shape: f32[2,8,32], index: 5, kind: output, shape index: {}]  }
   0x1   :  { %12 = vsyncpa [#allocation4 + $0x1], 0 }
   0x2   :  { %13 = vsyncpa [#allocation7], 0 }
   0x3   :  { %14 = vsyncpa [#allocation5], 0 }
   0x4   :  { %16 = vsyncpa [#allocation5 + $0x1], 0  ;;  %s1674_s18 = smov 0   ;;  %s1676_s19 = smov 0  }
   0x5   :  { %s1678_s20 = smov 0   ;;  %s1680_s21 = smov 0  }
   0x6 LB: > { %s1695_s22 = sadd.s32 4294967295, %s1619_s21   ;;  %s1229_s23 = sadd.s32 4294967294, %s1619_s21   ;;  %s1619_s21 = sphi %s1680_s21, %s2008_s21   ;;  %s1615_s20 = sphi %s1678_s20, %s2007_s20   ;;  %s1611_s19 = sphi %s1676_s19, %s2006_s19   ;;  %s1607_s18 = sphi %s1674_s18, %s2005_s18  }
   0x7   : > { %p42_p0 = scmp.ne.s32.totalorder %s1611_s19, %s1607_s18  ;;  %p1989_p1 = scmp.eq.s32.totalorder %s1695_s22, 0 }
   0x8   : > { %p156_p3 = scmp.eq.s32.totalorder %s1229_s23, 1  ;;  %p1230_p5 = scmp.ge.s32.totalorder %s1619_s21, 1 }
   0x9   : > { %p1704_p4 = por %p1989_p1, %p42_p0  ;;  %p163_p7 = scmp.lt.s32.totalorder %s1619_s21, 3 }
   0xa   : > { %p1709_p6 = por %p156_p3, %p42_p0  ;;  %s1621_s27 = smov [#allocation6]  }
   0xb   : > { %s1992_s24 = scalar_select %p1704_p4, 1, 0 }
   0xc   : > { %s1993_s25 = scalar_select %p1709_p6, 1, 0 }
   0xd   : > { %p1714_p8 = pnand %p1230_p5, %p163_p7  ;;  %s175_s28 = sshll.u32 %s1621_s27, 4  ;;  %s1718_s28 = int_to_ptr.vmem [resolvable:$true] %s175_s28 }
   0xe   : > { %s1622_s30 = smov [#allocation8]   ;;  %s1463_s9 = scalar_lea.hbm %s1984_s1, 512 }
   0xf   : > { %p1373_p9 = pneg %p1714_p8  ;;  %s191_s6 = sshll.u32 %s1622_s30, 4  ;;  %s1729_s6 = int_to_ptr.vmem [resolvable:$true] %s191_s6 }
  0x10   : > { %p1464_p12 = scmp.ne.s32.totalorder %s1984_s1, %s1463_s9  ;;  %p1470_p5 = scmp.lt.u32.totalorder %s1463_s9, %s1984_s1 }
  0x11   : > { %p1725_p11 = pnand %p1373_p9, %p1989_p1 }
  0x13   : > { %p1465_p13 = pneg %p1725_p11 }
  0x15   : > { %p1466_p0 = pnand %p1465_p13, %p1464_p12 }
  0x17   : > { %p1467_p3 = pneg %p1466_p0 }
  0x19   : > { %p1472_p7 = pnand %p1470_p5, %p1467_p3 }
  0x1b   : > { %1475 = shalt.err (!%p1472_p7)
}
  0x1c   : > { %s1476_s14 = scalar_lea.vmem %s1718_s28, 512  ;;  %p1484_p2 = scmp.lt.s32.totalorder %s1718_s28, %s1718_s28 }
  0x1d   : > { %p1477_p9 = scmp.ne.s32.totalorder %s1718_s28, %s1476_s14  ;;  %p1485_p12 = scmp.lt.s32.totalorder %s1476_s14, %s1476_s14 }
  0x1f   : > { %p1479_p10 = pnand %p1477_p9, %p1465_p13  ;;  %p1486_p0 = por %p1485_p12, %p1484_p2 }
  0x21   : > { %p1480_p1 = pneg %p1479_p10 }
  0x23   : > { %p1487_p6 = pnand %p1486_p0, %p1480_p1 }
  0x25   : > { %1490 = shalt.err (!%p1487_p6)
}
  0x26   : > { %s1623_s15 = smov 128   ;;  %s1624_s16 = smov 8  }
  0x27   : > { %1376 = dma.hbm_to_vmem [thread:$0]  (!%p1725_p11), %s1984_s1, 512, %s1718_s28, [#allocation7], %s1623_s15, %s1623_s15, %s1624_s16  }
  0x28   : > { %s1491_s7 = scalar_lea.hbm %s1986_s3, 512 }
  0x29   : > { %p1492_p2 = scmp.ne.s32.totalorder %s1986_s3, %s1491_s7  ;;  %p1498_p10 = scmp.lt.u32.totalorder %s1491_s7, %s1986_s3 }
  0x2b   : > { %p1494_p1 = pnand %p1492_p2, %p1465_p13 }
  0x2d   : > { %p1495_p6 = pneg %p1494_p1 }
  0x2f   : > { %p1500_p3 = pnand %p1498_p10, %p1495_p6 }
  0x31   : > { %1503 = shalt.err (!%p1500_p3)
}
  0x32   : > { %s1504_s28 = scalar_lea.vmem %s1729_s6, 512  ;;  %p1512_p12 = scmp.lt.s32.totalorder %s1729_s6, %s1729_s6 }
  0x33   : > { %p1505_p5 = scmp.ne.s32.totalorder %s1729_s6, %s1504_s28  ;;  %p1513_p0 = scmp.lt.s32.totalorder %s1504_s28, %s1504_s28 }
  0x35   : > { %p1507_p7 = pnand %p1505_p5, %p1465_p13  ;;  %p1514_p2 = por %p1513_p0, %p1512_p12 }
  0x37   : > { %p1508_p9 = pneg %p1507_p7 }
  0x39   : > { %p1515_p1 = pnand %p1514_p2, %p1508_p9 }
  0x3b   : > { %1518 = shalt.err (!%p1515_p1)
}
  0x3c   : > { %1379 = dma.hbm_to_vmem [thread:$0]  (!%p1725_p11), %s1986_s3, 512, %s1729_s6, [#allocation7], %s1623_s15, %s1623_s15, %s1624_s16  }
  0x3d   : > { %s1784_s14 = sadd.s32 1, %s1619_s21   ;;  %s29_s29 = sadd.s32 1, %s1615_s20 }
  0x3e   : > { %s26_s17 = ssub.s32 %s1619_s21, %s1784_s14  ;;  %p36_p13 = scmp.ne.s32.totalorder %s1615_s20, %s1611_s19 }
  0x3f   : > { %p27_p6 = scmp.eq.s32.totalorder %s26_s17, 0  ;;  %p37_p10 = scmp.eq.s32.totalorder %s1619_s21, 0 }
  0x40   : > { %p1996_p3 = scmp.eq.s32.totalorder %s1695_s22, 1  ;;  %p1390_p7 = scmp.lt.s32.totalorder %s1619_s21, 2 }
  0x41   : > { %s1800_s27 = scalar_select %p27_p6, %s1615_s20, %s29_s29  }
  0x42   : > { %p1794_p5 = por %p1996_p3, %p36_p13  ;;  %p38_p9 = por %p37_p10, %p36_p13 }
  0x43   : > { %s208_s30 = sand.u32 1, %s1615_s20   ;;  %s1235_s6 = sshll.u32 %s1619_s21, 7 }
  0x44   : > { %s1997_s23 = scalar_select %p1794_p5, 1, 0 }
  0x45   : > { %s1234_s7 = sshll.u32 %s208_s30, 3  ;;  %s1807_s8 = scalar_lea.hbm %s1983_s0, %s1235_s6 }
  0x46   : > { %s212_s9 = scalar_lea.vmem [#allocation3], %s1234_s7  ;;  %p1811_p11 = pnand %p1390_p7, %p38_p9 }
  0x47   : > { %s219_s10 = sshll.u32 %s212_s9, 4  ;;  %s209_s28 = scalar_lea.sflag [#allocation4], %s208_s30  ;;  %s1809_s10 = int_to_ptr.vmem [resolvable:$true] %s219_s10 }
  0x48   : > { %s1519_s12 = scalar_lea.hbm %s1807_s8, 128  ;;  %p1521_p0 = pneg %p1811_p11 }
  0x49   : > { %p1520_p12 = scmp.ne.s32.totalorder %s1807_s8, %s1519_s12  ;;  %s1524_s17 = scalar_lea.hbm %s1983_s0, 256 }
  0x4a   : > { %p1525_p13 = scmp.lt.u32.totalorder %s1807_s8, %s1983_s0  ;;  %p1526_p6 = scmp.lt.u32.totalorder %s1524_s17, %s1519_s12 }
  0x4b   : > { %p1522_p2 = pnand %p1521_p0, %p1520_p12  ;;  %p1528_p3 = scmp.lt.u32.totalorder %s1519_s12, %s1807_s8 }
  0x4c   : > { %p1527_p10 = por %p1526_p6, %p1525_p13 }
  0x4d   : > { %p1523_p1 = pneg %p1522_p2 }
  0x4e   : > { %p1529_p7 = por %p1528_p3, %p1527_p10 }
  0x50   : > { %p1530_p9 = pnand %p1529_p7, %p1523_p1 }
  0x52   : > { %1533 = shalt.err (!%p1530_p9)
}
  0x53   : > { %s1534_s30 = scalar_lea.vmem %s1809_s10, 128  ;;  %s1625_s15 = smov [#allocation3]  }
  0x54   : > { %p1535_p12 = scmp.ne.s32.totalorder %s1809_s10, %s1534_s30  ;;  %s1539_s16 = sshll.u32 %s1625_s15, 4  ;;  %s1540_s16 = int_to_ptr.vmem [resolvable:$false] %s1539_s16 }
  0x55   : > { %s1541_s9 = scalar_lea.vmem %s1540_s16, 256  ;;  %p1542_p4 = scmp.lt.s32.totalorder %s1809_s10, %s1540_s16 }
  0x56   : > { %p1537_p2 = pnand %p1535_p12, %p1521_p0  ;;  %p1543_p13 = scmp.lt.s32.totalorder %s1541_s9, %s1534_s30 }
  0x58   : > { %p1538_p5 = pneg %p1537_p2  ;;  %p1544_p6 = por %p1543_p13, %p1542_p4 }
  0x5a   : > { %p1545_p10 = pnand %p1544_p6, %p1538_p5 }
  0x5c   : > { %1548 = shalt.err (!%p1545_p10)
}
  0x5d   : > { %1383 = dma.hbm_to_vmem [thread:$0]  (!%p1811_p11), %s1807_s8, 128, %s1809_s10, %s209_s28  }
  0x5e   : > { %228 = sbr.rel (%p1714_p8) target bundleno = 1768 (0x6e8), region = 40  ;;  %s1843_s12 = sand.u32 (!%p1714_p8), 1, %s1611_s19  }
  0x5f   : > { %s1237_s13 = sshll.u32 (!%p1714_p8), %s1843_s12, 3  ;;  %s231_s29 = scalar_lea.sflag (!%p1714_p8), [#allocation4], %s1843_s12 }
  0x60   : > { %s234_s17 = scalar_lea.vmem (!%p1714_p8), [#allocation3], %s1237_s13  ;;  %p1999_p4 = scmp.ne.s32.totalorder (!%p1714_p8), %s1992_s24, 0 }
  0x65   : > { %1594 = dma.done.wait (%p1999_p4), %s231_s29, 128  }
  0x66   : > { %1596 = vsyncadd (%p1999_p4), %s231_s29, 4294967168  ;;  %p2000_p5 = scmp.eq.s32.totalorder %s1695_s22, 0 }
  0x68   : > { %1598 = dma.done.wait (%p2000_p5), [#allocation7], 1024   ;;  %p2001_p8 = pmov %p2000_p5 }
  0x69   : > { %v1626_v0 = vmov 0.0|0.0   ;;  %vm1627_vm0 = vmmov 0   ;;  %v1628_v1 = vmov 0.0   ;;  %v270_v2 = vld [vmem:[#allocation6] sm:$0xff]  ;;  %v271_v3 = vld [vmem:[#allocation6 + $0x8] sm:$0xff]  ;;  %v272_v4 = vld [vmem:[#allocation6 + $0x10] sm:$0xff] }
  0x6a   : > { %1600 = vsyncadd (%p2001_p8), [#allocation7], 4294966272  ;;  %1349 = vmatprep.subr.bf16.mxu0 %v1626_v0  ;;  %1295 = vmatprep.mubr.msk.f32.mxu0 %vm1627_vm0, %v1628_v1  ;;  %v1350_v5 = vpack.c.bf16 %v271_v3, %v270_v2  ;;  %v273_v6 = vld [vmem:[#allocation6 + $0x18] sm:$0xff]  ;;  %vm281_vm1 = vcmask 261120   ;;  %v1241_v9 = vld [vmem:[%s1985_s2] ss:$0 sm:$0xff] }
  0x6b   : > { %1298 = vmatprep.subr.mxu1 %v1628_v1  ;;  %1300 = vmatprep.mubr.msk.f32.mxu1 %vm1627_vm0, %v1628_v1  ;;  %v1353_v7 = vpack.c.bf16 %v273_v6, %v272_v4  ;;  %v269_v8 = vld [vmem:[%s234_s17] sm:$0xff]  ;;  %s1629_s8 = smov 64   ;;  %s1630_s10 = smov 96   ;;  %vm359_vm2 = vcmask 64512   ;;  %v1040_v3 = vld [vmem:[#allocation8] sm:$0xff]  ;;  %v1041_v4 = vld [vmem:[#allocation8 + $0x8] sm:$0xff] }
  0x6c   : > { %1351 = vmatpush3.bf16.msra.mxu0 %v1350_v5  ;;  %s1631_s11 = smov 88   ;;  %s1632_s28 = smov 120   ;;  %v1042_v5 = vld [vmem:[#allocation8 + $0x10] sm:$0xff]  ;;  %v1043_v6 = vld [vmem:[#allocation8 + $0x18] sm:$0xff]  ;;  %vm693_vm3 = vcmask 130112   ;;  %vm865_vm4 = vcmask 195712  }
  0x6d   : > { %1352 = vmatprep.subr.bf16.mxu0 %v1626_v0  ;;  %s1633_s7 = smov 80   ;;  %s1634_s6 = smov 112   ;;  %vm1037_vm5 = vcmask 261312  }
  0x6e   : > { %s1635_s30 = smov 72   ;;  %s1636_s15 = smov 104  }
  0x6f   : > { %s1637_s16 = smov 56   ;;  %s1638_s9 = smov 40  }
  0x70   : > { %1354 = vmatpush3.bf16.msra.mxu0 %v1353_v7  ;;  %s1639_s29 = smov 48   ;;  %s1640_s17 = smov 8  }
  0x71   : > { %1318 = vmatprep.subr.mxu0 %v1628_v1  ;;  %s1641_s24 = smov 16   ;;  %s1642_s26 = smov 24  }
  0x72   : > { %p2002_p0 = scmp.ne.s32.totalorder %s1997_s23, 0 }
  0x73   : > { %1296 = vmatmul.mubr.msk.f32.vlgmr.msra.gmra.mrb[0].mxu0 %vm281_vm1, %v269_v8 }
  0x74   : > { %1320 = vmatprep.mubr.msk.f32.mxu0 %vm1627_vm0, %v1628_v1 }
 0x146   : > { %v351_v10 = vpop.f32.mrb[0].mxu0 }
 0x147   : > { %v352_v11 = vadd.f32 %v1241_v9, %v351_v10  ;;  %v1297_v12 = vpop.f32.mrb[1].mxu0  ;;  %v1359_v9 = vpack.c.bf16 %v1043_v6, %v1042_v5 }
 0x149   : > { %v1871_v13 = vmax.f32 %v352_v11, 0.0 }
 0x14b   : > { %443 = vrot.lane.b32.xlu1 %v1871_v13, %s1629_s8  ;;  %357 = vrot.lane.b32.xlu0 %v1871_v13, %s1630_s10 }
 0x14f   : > { %525 = vrot.lane.b32.xlu1 %v1871_v13, %s1631_s11  ;;  %s1258_s11 = sshll.u32 %s1695_s22, 7 }
 0x153   : > { %523 = vrot.lane.b32.xlu1 %v1871_v13, %s1632_s28  ;;  %s268_s28 = scalar_lea.vmem [#allocation9], %s1237_s13  ;;  %s1643_s13 = smov [#allocation9]  }
 0x157   : > { %697 = vrot.lane.b32.xlu1 %v1871_v13, %s1633_s7  ;;  %s1140_s7 = sshll.u32 %s268_s28, 4  ;;  %s1940_s7 = int_to_ptr.vmem [resolvable:$true] %s1140_s7 }
 0x158   : > { %s1549_s22 = scalar_lea.vmem %s1940_s7, 128 }
 0x159   : > { %p1550_p11 = scmp.ne.s32.totalorder %s1940_s7, %s1549_s22 }
 0x15b   : > { %695 = vrot.lane.b32.xlu1 %v1871_v13, %s1634_s6  ;;  %p1551_p1 = pnand %p1550_p11, %p2002_p0 }
 0x15d   : > { %p1552_p3 = pneg %p1551_p1 }
 0x15f   : > { %869 = vrot.lane.b32.xlu1 %v1871_v13, %s1635_s30 }
 0x163   : > { %867 = vrot.lane.b32.xlu1 %v1871_v13, %s1636_s15  ;;  %s1938_s15 = scalar_lea.hbm %s1988_s5, %s1258_s11 }
 0x1bd   : > { %v444_v14 = vpop.permute.xlu1 %443  ;;  %v358_v15 = vpop.permute.xlu0 %357 }
 0x1be   : > { %1299 = vmatpush3.xpose.msk.msra.mxu1 %vm359_vm2, %v358_v15 }
 0x1bf   : > { %1303 = vmatprep.subr.mxu1 %v1628_v1 }
 0x1c1   : > { %v526_v16 = vpop.permute.xlu1 %525  ;;  %1301 = vmatmul.mubr.msk.f32.vlgmr.msra.gmra.mrb[0].mxu1 %vm359_vm2, %v1871_v13 }
 0x1c2   : > { %1304 = vmatpush3.msra.mxu1 %v444_v14  ;;  %1305 = vmatprep.mubr.msk.f32.mxu1 %vm1627_vm0, %v1628_v1 }
 0x1c3   : > { %1308 = vmatprep.subr.mxu1 %v1628_v1 }
 0x1c5   : > { %v524_v17 = vpop.permute.xlu1 %523 }
 0x1c9   : > { %v698_v18 = vpop.permute.xlu1 %697 }
 0x1ca   : > { %1319 = vmatpush3.xpose.msk.msra.mxu0 %vm359_vm2, %v698_v18 }
 0x1cb   : > { %1328 = vmatprep.subr.mxu0 %v1628_v1 }
 0x1cd   : > { %v696_v19 = vpop.permute.xlu1 %695 }
 0x1ce   : > { %1321 = vmatmul.mubr.msk.f32.vlgmr.msra.gmra.mrb[2].mxu0 %vm359_vm2, %v696_v19 }
 0x1cf   : > { %1330 = vmatprep.mubr.msk.f32.mxu0 %vm1627_vm0, %v1628_v1 }
 0x1d1   : > { %v870_v20 = vpop.permute.xlu1 %869 }
 0x1d2   : > { %1329 = vmatpush3.xpose.msk.msra.mxu0 %vm359_vm2, %v870_v20 }
 0x1d3   : > { %1355 = vmatprep.subr.bf16.mxu0 %v1626_v0 }
 0x1d5   : > { %v868_v21 = vpop.permute.xlu1 %867 }
 0x1d6   : > { %1331 = vmatmul.mubr.msk.f32.vlgmr.msra.gmra.mrb[4].mxu0 %vm359_vm2, %v868_v21 }
 0x1d7   : > { %1346 = vmatprep.mubr.msk.f32.mxu0 %vm1627_vm0, %v1628_v1 }
 0x294   : > { %v430_v22 = vpop.f32.mrb[0].mxu1 }
 0x295   : > { %v1302_v23 = vpop.f32.mrb[1].mxu1  ;;  %v434_v24 = vsel %vm359_vm2, %v430_v22, -inf }
 0x296   : > { %435 = vmax.xlane.f32.xlu0 %v434_v24  ;;  %v1255_v23 = vld [vmem:[%s1987_s4] ss:$0 sm:$0xff] }
 0x2a1   : > { %v769_v25 = vpop.f32.mrb[2].mxu0 }
 0x2a2   : > { %v1322_v26 = vpop.f32.mrb[3].mxu0  ;;  %v773_v29 = vsel %vm359_vm2, %v769_v25, -inf }
 0x2a9   : > { %v941_v27 = vpop.f32.mrb[4].mxu0 }
 0x2aa   : > { %v1332_v28 = vpop.f32.mrb[5].mxu0  ;;  %v945_v30 = vsel %vm359_vm2, %v941_v27, -inf }
 0x2ac   : > { %610 = vrot.lane.b32.xlu0 %v1871_v13, %s1637_s16  ;;  %s1127_s16 = scalar_lea.sflag [#allocation5], %s1843_s12 }
 0x2cb   : > { %774 = vmax.xlane.f32.xlu0 %v773_v29 }
 0x2cf   : > { %946 = vmax.xlane.f32.xlu0 %v945_v30 }
 0x2e5   : > { %954 = vrot.lane.b32.xlu0 %v1871_v13, %s1638_s9  ;;  %s1553_s9 = sshll.u32 %s1643_s13, 4  ;;  %s1554_s9 = int_to_ptr.vmem [resolvable:$false] %s1553_s9 }
 0x2e6   : > { %p1556_p7 = scmp.lt.s32.totalorder %s1940_s7, %s1554_s9 }
 0x323   : > { %v436_v31 = vpop.xlane.xlu0 %435 }
 0x324   : > { %v437_v32 = vsub.f32 %v430_v22, %v436_v31 }
 0x326   : > { %v438_v33 = vmul.f32 1.442695, %v437_v32 }
 0x327   : > { %v611_v35 = vpop.permute.xlu0 %610 }
 0x328   : > { %1447 = vpow2.f32 %v438_v33 }
 0x332   : > { %v1448_v34 = vpop.eup %1447 }
 0x333   : > { %1306 = vmatmul.mubr.msk.f32.vlgmr.msra.gmra.mrb[2].mxu1 %vm359_vm2, %v1448_v34  ;;  %v440_v58 = vsel %vm359_vm2, %v1448_v34, 0.0 }
 0x334   : > { %1309 = vmatpush3.xpose.msk.msra.mxu1 %vm359_vm2, %v526_v16  ;;  %1310 = vmatprep.mubr.msk.f32.mxu1 %vm1627_vm0, %v1628_v1 }
 0x335   : > { %1313 = vmatprep.subr.mxu1 %v1628_v1 }
 0x337   : > { %1311 = vmatmul.mubr.msk.f32.vlgmr.msra.gmra.mrb[4].mxu1 %vm359_vm2, %v524_v17 }
 0x338   : > { %1314 = vmatpush3.msra.mxu1 %v611_v35  ;;  %1315 = vmatprep.mubr.msk.f32.mxu1 %vm1627_vm0, %v1628_v1 }
 0x339   : > { %1323 = vmatprep.subr.mxu1 %v1628_v1 }
 0x358   : > { %v775_v41 = vpop.xlane.xlu0 %774 }
 0x359   : > { %v776_v42 = vsub.f32 %v769_v25, %v775_v41 }
 0x35b   : > { %v777_v43 = vmul.f32 1.442695, %v776_v42 }
 0x35c   : > { %v947_v46 = vpop.xlane.xlu0 %946 }
 0x35d   : > { %1449 = vpow2.f32 %v777_v43  ;;  %v948_v47 = vsub.f32 %v941_v27, %v947_v46 }
 0x35f   : > { %v949_v50 = vmul.f32 1.442695, %v948_v47 }
 0x360   : > { %v955_v56 = vpop.permute.xlu0 %954 }
 0x367   : > { %v1450_v44 = vpop.eup %1449 }
 0x368   : > { %v779_v45 = vsel %vm359_vm2, %v1450_v44, 0.0 }
 0x406   : > { %v515_v36 = vpop.f32.mrb[2].mxu1 }
 0x407   : > { %v1307_v37 = vpop.f32.mrb[3].mxu1 }
 0x40a   : > { %v597_v38 = vpop.f32.mrb[4].mxu1 }
 0x40b   : > { %v1312_v39 = vpop.f32.mrb[5].mxu1  ;;  %v601_v40 = vsel %vm359_vm2, %v597_v38, -inf }
 0x40c   : > { %602 = vmax.xlane.f32.xlu1 %v601_v40 }
 0x41d   : > { %782 = vrot.lane.b32.xlu1 %v1871_v13, %s1639_s29  ;;  %s1555_s29 = scalar_lea.vmem %s1554_s9, 256 }
 0x41e   : > { %p1557_p9 = scmp.lt.s32.totalorder %s1555_s29, %s1549_s22 }
 0x420   : > { %p1558_p12 = por %p1557_p9, %p1556_p7 }
 0x422   : > { %p1559_p2 = pnand %p1558_p12, %p1552_p3 }
 0x441   : > { %780 = vadd.xlane.f32.xlu1 %v779_v45 }
 0x499   : > { %v603_v48 = vpop.xlane.xlu1 %602 }
 0x49a   : > { %v604_v49 = vsub.f32 %v597_v38, %v603_v48 }
 0x49c   : > { %v605_v51 = vmul.f32 1.442695, %v604_v49 }
 0x49d   : > { %v783_v53 = vpop.permute.xlu1 %782 }
 0x49e   : > { %1451 = vpow2.f32 %v605_v51 }
 0x49f   : > { %1453 = vpow2.f32 %v949_v50 }
 0x4a8   : > { %v1452_v52 = vpop.eup %1451 }
 0x4a9   : > { %1316 = vmatmul.mubr.msk.f32.vlgmr.msra.gmra.mrb[6].mxu1 %vm359_vm2, %v1452_v52  ;;  %v607_v54 = vsel %vm359_vm2, %v1452_v52, 0.0  ;;  %v1454_v55 = vpop.eup %1453 }
 0x4aa   : > { %1324 = vmatpush3.msra.mxu1 %v783_v53  ;;  %608 = vadd.xlane.f32.xlu0 %v607_v54  ;;  %v951_v57 = vsel %vm359_vm2, %v1454_v55, 0.0 }
 0x4ab   : > { %1325 = vmatprep.mubr.msk.f32.mxu1 %vm1627_vm0, %v1628_v1  ;;  %1333 = vmatprep.subr.mxu1 %v1628_v1 }
 0x4ad   : > { %1326 = vmatmul.mubr.msk.f32.vlgmr.msra.gmra.mrb[8].mxu1 %vm359_vm2, %v1450_v44 }
 0x4ae   : > { %1334 = vmatpush3.msra.mxu1 %v955_v56  ;;  %952 = vadd.xlane.f32.xlu0 %v951_v57 }
 0x4af   : > { %1335 = vmatprep.mubr.msk.f32.mxu1 %vm1627_vm0, %v1628_v1  ;;  %v1356_v1 = vpack.c.bf16 %v1041_v4, %v1040_v3 }
 0x4b1   : > { %1336 = vmatmul.mubr.msk.f32.vlgmr.msra.gmra.mrb[10].mxu1 %vm359_vm2, %v1454_v55  ;;  %1357 = vmatpush3.bf16.msra.mxu0 %v1356_v1 }
 0x4b2   : > { %441 = vadd.xlane.f32.xlu0 %v440_v58  ;;  %1358 = vmatprep.subr.bf16.mxu0 %v1626_v0 }
 0x4b5   : > { %1360 = vmatpush3.bf16.msra.mxu0 %v1359_v9 }
 0x4ce   : > { %v781_v2 = vpop.xlane.xlu1 %780 }
 0x537   : > { %v609_v59 = vpop.xlane.xlu0 %608 }
 0x53b   : > { %v953_v60 = vpop.xlane.xlu0 %952 }
 0x53f   : > { %v442_v61 = vpop.xlane.xlu0 %441 }
 0x540   : > { %1455 = vrcp.f32 %v442_v61 }
 0x541   : > { %1457 = vrcp.f32 %v609_v59 }
 0x542   : > { %1459 = vrcp.f32 %v781_v2 }
 0x543   : > { %1461 = vrcp.f32 %v953_v60 }
 0x54a   : > { %v1456_v62 = vpop.eup %1455 }
 0x54b   : > { %v521_v63 = vmul.f32 %v1456_v62, %v515_v36  ;;  %v1458_v7 = vpop.eup %1457 }
 0x54c   : > { %v1460_v12 = vpop.eup %1459 }
 0x54d   : > { %522 = vst.msk [vmem:[#allocation2] sm:$0xff] %vm359_vm2, %v521_v63  ;;  %v1462_v16 = vpop.eup %1461 }
 0x57c   : > { %v682_v8 = vpop.f32.mrb[6].mxu1 }
 0x57d   : > { %v688_v10 = vmul.f32 %v1458_v7, %v682_v8  ;;  %v1317_v11 = vpop.f32.mrb[7].mxu1 }
 0x57f   : > { %690 = vrot.lane.b32.xlu0 %v688_v10, %s1640_s17 }
 0x580   : > { %v854_v13 = vpop.f32.mrb[8].mxu1 }
 0x581   : > { %v860_v14 = vmul.f32 %v1460_v12, %v854_v13  ;;  %v1327_v15 = vpop.f32.mrb[9].mxu1 }
 0x583   : > { %862 = vrot.lane.b32.xlu1 %v860_v14, %s1641_s24 }
 0x584   : > { %v1026_v17 = vpop.f32.mrb[10].mxu1 }
 0x585   : > { %v1032_v18 = vmul.f32 %v1462_v16, %v1026_v17  ;;  %v1337_v19 = vpop.f32.mrb[11].mxu1 }
 0x587   : > { %1034 = vrot.lane.b32.xlu0 %v1032_v18, %s1642_s26 }
 0x5f1   : > { %v691_v20 = vpop.permute.xlu0 %690 }
 0x5f2   : > { %694 = vst.msk [vmem:[#allocation2] sm:$0xff] %vm693_vm3, %v691_v20 }
 0x5f5   : > { %v863_v0 = vpop.permute.xlu1 %862 }
 0x5f6   : > { %866 = vst.msk [vmem:[#allocation2] sm:$0xff] %vm865_vm4, %v863_v0 }
 0x5f9   : > { %v1035_v21 = vpop.permute.xlu0 %1034 }
 0x5fa   : > { %1038 = vst.msk [vmem:[#allocation2] sm:$0xff] %vm1037_vm5, %v1035_v21 }
 0x601   : > { %v1039_v22 = vld [vmem:[#allocation2] sm:$0xff] }
 0x602   : > { %1347 = vmatmul.mubr.msk.f32.vlgmr.msra.gmra.mrb[6].mxu0 %vm281_vm1, %v1039_v22 }
 0x6d5   : > { %v1120_v24 = vpop.f32.mrb[6].mxu0 }
 0x6d6   : > { %v1121_v25 = vadd.f32 %v1255_v23, %v1120_v24  ;;  %v1348_v26 = vpop.f32.mrb[7].mxu0 }
 0x6d8   : > { %v1124_v27 = vmax.f32 %v1121_v25, 0.0 }
 0x6da   : > { %1125 = vst.msk [vmem:[%s268_s28] sm:$0xff] %vm281_vm1, %v1124_v27 }
 0x6db   : > { %1562 = shalt.err (!%p1559_p2)
}
 0x6dc   : > { %s1563_s12 = scalar_lea.hbm %s1938_s15, 128  ;;  %s1567_s26 = scalar_lea.hbm %s1988_s5, 256 }
 0x6dd   : > { %p1564_p13 = scmp.ne.s32.totalorder %s1938_s15, %s1563_s12  ;;  %p1568_p4 = scmp.lt.u32.totalorder %s1938_s15, %s1988_s5 }
 0x6de   : > { %p1569_p5 = scmp.lt.u32.totalorder %s1567_s26, %s1563_s12  ;;  %p1571_p11 = scmp.lt.u32.totalorder %s1563_s12, %s1938_s15 }
 0x6df   : > { %p1565_p6 = pnand %p1564_p13, %p2002_p0 }
 0x6e0   : > { %p1570_p8 = por %p1569_p5, %p1568_p4 }
 0x6e1   : > { %p1566_p10 = pneg %p1565_p6 }
 0x6e2   : > { %p1572_p1 = por %p1571_p11, %p1570_p8 }
 0x6e4   : > { %p1573_p3 = pnand %p1572_p1, %p1566_p10 }
 0x6e6   : > { %1576 = shalt.err (!%p1573_p3)
}
 0x6e7   : > { %1371 = dma.vmem_to_hbm [thread:$0]  (%p2002_p0), %s1940_s7, 128, %s1938_s15, %s1127_s16  }
 0x6e8 PF: > { %s1152_s11 = sand.u32 1, %s1607_s18   ;;  %p2003_p7 = scmp.ne.s32.totalorder %s1993_s25, 0 }
 0x6e9   : > { %p2004_p9 = scmp.ge.s32.totalorder %s1619_s21, 2  ;;  %s1153_s28 = scalar_lea.sflag [#allocation5], %s1152_s11 }
 0x6eb   : > { %p1385_p12 = pnand %p2004_p9, %p2003_p7 }
 0x6ed   : > { %1602 = dma.done.wait (!%p1385_p12), %s1153_s28, 128  }
 0x6ee   : > { %1604 = vsyncadd (!%p1385_p12), %s1153_s28, 4294967168  ;;  %p19_p2 = scmp.ge.s32.totalorder %s1784_s14, 4   ;;  %s2005_s18 = smov %s1611_s19 }
 0x6ef   : > { %s2006_s19 = smov %s1615_s20  ;;  %s2007_s20 = smov %s1800_s27 }
 0x6f0   : > { %s2008_s21 = smov %s1784_s14  ;;  %21 = sbr.rel (!%p19_p2) target bundleno = 6 (0x6), region = 93 }
 0x6f7   :  { %1158 = vsyncpa [#allocation4], 1 }
 0x6f8   :  { %1160 = vsyncpa [#allocation4 + $0x1], 1 }
 0x6f9   :  { %1161 = vsyncpa [#allocation7], 1 }
 0x6fa   :  { %1162 = vsyncpa [#allocation5], 1 }
 0x6fb   :  { %1164 = vsyncpa [#allocation5 + $0x1], 1 }

</bundles_post_ra>
